<compile_context>
chip_gen: v7x
topology: tpu7x:2x2x1
jax: 0.10.0
libtpu: 0.0.40
codegen_flags: <defaults>
</compile_context>

<pallas_src>
import functools
import math

import jax
import jax.numpy as jnp
from jax.experimental import pallas as pl
from jax.experimental.pallas import tpu as pltpu


def t2d_fused_kernel(x_ref, mask_ref,
                     dw_w_ref, dw_b_ref, pw_w_ref, pw_b_ref,
                     ln_w_ref, ln_b_ref, out_w_ref, out_b_ref,
                     o_ref, *, kernel_size):
    """One layer step of the fused T2d forward (grid = (num_layers,)).

    x_ref    : (B, H, W, C)  original input (read only at layer 0)
    mask_ref : (B, H, W, 1)  attention mask, broadcast over channels in-kernel
    dw_w_ref : (K*K, C)      depthwise conv weights   (torch (C,1,K,K) remapped)
    dw_b_ref : (1, C)        depthwise conv bias
    pw_w_ref : (C, C) bf16   1x1 conv, (C_in, C_out) = torch weight[:, :, 0, 0].T
    ln_w/b   : (1, C)        channel LayerNorm scale / shift
    out_w/b  : (C, C) bf16 / (1, C)  output 1x1 conv
    o_ref    : (B, H, W, C)  output block; doubles as the VMEM-resident
                             activation carried across the layer axis
                             (constant out index_map -> one HBM writeback).
    """
    B, H, W, C = o_ref.shape
    K = kernel_size
    p = K // 2
    layer = pl.program_id(0)

    @pl.when(layer == 0)
    def _init():
        o_ref[...] = x_ref[...].astype(o_ref.dtype)

    act = o_ref[...].astype(jnp.float32)      # (B,H,W,C), resident in VMEM
    mask = mask_ref[...]                      # (B,H,W,1)

    # masked_fill(span_states, attention_mask.eq(0), 0.0)
    masked = jnp.where(mask == 0.0, 0.0, act)

    # --- depthwise KxK conv (groups=C, padding=K//2), fully in registers ----
    # W (sublane) shifts: XLU rotate.  pltpu.roll follows jnp.roll semantics
    # (out[j] = in[(j - shift) % W]); we want out[j] = x[j + oj] => shift = -oj,
    # and the wrapped edge rows are zeroed with an iota mask.
    w_idx = jax.lax.broadcasted_iota(jnp.int32, (W, C), 0)   # sublane index j
    shifted_w = []
    for dj in range(K):
        oj = dj - p
        if oj == 0:
            shifted_w.append(masked)
        else:
            rolled = pltpu.roll(masked, (-oj) % W, axis=2)   # out[j] = x[j+oj]
            valid = jnp.logical_and(w_idx + oj >= 0, w_idx + oj < W)
            shifted_w.append(jnp.where(valid, rolled, 0.0))

    # H shifts: H is a major dim, so a shift is just a slice + concat with
    # zeros (vreg selection, no cross-lane movement).
    def shift_h(v, oi):                       # out[:, i] = v[:, i+oi], 0 if OOB
        if oi == 0:
            return v
        if oi > 0:
            return jnp.concatenate([v[:, oi:], jnp.zeros_like(v[:, :oi])],
                                   axis=1)
        return jnp.concatenate([jnp.zeros_like(v[:, oi:]), v[:, :oi]], axis=1)

    dw_w = dw_w_ref[...]                                     # (K*K, C) f32
    # Bias folded into the accumulator init (no zeros materialization).
    dw = jnp.broadcast_to(dw_b_ref[...], (B, H, W, C))
    for di in range(K):
        oi = di - p
        for dj in range(K):
            dw = dw + shift_h(shifted_w[dj], oi) * dw_w[di * K + dj]

    # --- 1x1 conv on the MXU: bf16 operands, f32 accumulation ---------------
    m = B * H * W                              # whole batch folded into MXU M
    attn = jnp.dot(dw.reshape(m, C).astype(jnp.bfloat16), pw_w_ref[...],
                   preferred_element_type=jnp.float32).reshape(B, H, W, C)
    attn = attn + pw_b_ref[...]
    # Keep the explicit mask multiply: attention_prob * attention_mask only
    # folds into `masked` when the mask is strictly binary.
    attn = attn * mask
    context = attn * masked                    # attention_prob * span_states

    # --- residual #1 (uses the UNMASKED input, as in the torch module) ------
    res1 = context + act

    # --- channel LayerNorm (eps = 1e-6, biased variance) --------------------
    inv_c = 1.0 / C
    u = jnp.sum(res1, axis=-1, keepdims=True) * inv_c
    d = res1 - u
    s = jnp.sum(d * d, axis=-1, keepdims=True) * inv_c
    ln = d * jax.lax.rsqrt(s + 1e-6)           # rsqrt on EUP
    ln = ln * ln_w_ref[...] + ln_b_ref[...]

    # --- residual #2 + output 1x1 conv + GELU --------------------------------
    y = ln + act
    o = jnp.dot(y.reshape(m, C).astype(jnp.bfloat16), out_w_ref[...],
                preferred_element_type=jnp.float32)
    o = o + out_b_ref[...]
    # TODO(synk): torch.nn.GELU() default is exact erf; the tanh form (EUP
    #   tanh) differs by <~1e-3 abs — swap in an erf-based GELU if strict
    #   parity is required.
    c0 = math.sqrt(2.0 / math.pi)
    o = 0.5 * o * (1.0 + jnp.tanh(c0 * (o + 0.044715 * (o * o * o))))

    o_ref[...] = o.reshape(B, H, W, C).astype(o_ref.dtype)


def t2d_forward(x_nhwc, mask_bhw, params, kernel_size):
    """T2d.forward (output_attentions=False, output_hidden_states=False).

    x_nhwc  : (B, H, W, C) float32
    mask_bhw: (B, H, W)    float32 (0 = masked)
    params  : dict of layer-stacked weights (see make_params)
    """
    B, H, W, C = x_nhwc.shape
    L = params["dw_w"].shape[0]
    K = kernel_size

    mask4 = mask_bhw[..., None].astype(jnp.float32)          # (B, H, W, 1)

    kernel = functools.partial(t2d_fused_kernel, kernel_size=K)

    def full_map(l):        # x / mask / output: one resident block for all layers
        return (0, 0, 0, 0)

    def layer_map(l):       # stacked weights: one block per layer (auto-pipelined)
        return (l, 0, 0)

    grid_spec = pltpu.PrefetchScalarGridSpec(
        num_scalar_prefetch=0,
        grid=(L,),                                           # layers only
        in_specs=[
            pl.BlockSpec((B, H, W, C), full_map),            # x (fetched once)
            pl.BlockSpec((B, H, W, 1), full_map),            # mask (fetched once)
            pl.BlockSpec((None, K * K, C), layer_map),       # dw_w
            pl.BlockSpec((None, 1, C), layer_map),           # dw_b
            pl.BlockSpec((None, C, C), layer_map),           # pw_w (bf16)
            pl.BlockSpec((None, 1, C), layer_map),           # pw_b
            pl.BlockSpec((None, 1, C), layer_map),           # ln_w
            pl.BlockSpec((None, 1, C), layer_map),           # ln_b
            pl.BlockSpec((None, C, C), layer_map),           # out_w (bf16)
            pl.BlockSpec((None, 1, C), layer_map),           # out_b
        ],
        out_specs=pl.BlockSpec((B, H, W, C), full_map),      # activation carry
    )

    # TODO(synk): at production sizes (a) add a "parallel" batch / H-super-tile
    #   grid axis so both v7x TensorCores are fed, (b) set vmem_limit_bytes
    #   explicitly (re-derive for v7x's 64 MiB/TC, 16/32 MiB default scoped
    #   limits on v5e/v6e) and tile H with a K//2 halo, and (c) deepen weight
    #   buffering (pipeline_mode=pl.Buffered(3)) or keep all L layers' weights
    #   resident to hide per-layer weight DMAs.
    # TODO(synk): C=32 fills only 25% of the 128-lane vregs; if C stays this
    #   small at scale, pack 4 batch elements (or W columns) onto the lane dim
    #   for the elementwise / LayerNorm path.
    return pl.pallas_call(
        kernel,
        out_shape=jax.ShapeDtypeStruct((B, H, W, C), x_nhwc.dtype),
        grid_spec=grid_spec,
        compiler_params=pltpu.CompilerParams(
            dimension_semantics=("arbitrary",)),             # layer axis carries state
    )(x_nhwc, mask4,
      params["dw_w"], params["dw_b"],
      params["pw_w"], params["pw_b"],
      params["ln_w"], params["ln_b"],
      params["out_w"], params["out_b"])


def make_params(key, num_layers, hidden_size, kernel_size):
    """Layer-stacked parameters (leading axis = layer).

    Mapping from torch:
      dw_w[l, ki*K+kj, c] = depthwise_conv.weight[c, 0, ki, kj]          (f32)
      pw_w[l]             = conv1x1.weight[:, :, 0, 0].T  (C_in, C_out)  (bf16)
      out_w[l]            = out conv1x1.weight[:, :, 0, 0].T             (bf16)
      ln_w/ln_b[l, 0, :]  = LayerNorm weight/bias (1, C, 1, 1) squeezed  (f32)
    """
    L, C, K = num_layers, hidden_size, kernel_size
    ks = jax.random.split(key, 6)
    sc = 1.0 / math.sqrt(C)
    return dict(
        dw_w=0.1 * jax.random.normal(ks[0], (L, K * K, C), jnp.float32),
        dw_b=0.01 * jax.random.normal(ks[1], (L, 1, C), jnp.float32),
        pw_w=(sc * jax.random.normal(ks[2], (L, C, C), jnp.float32)
              ).astype(jnp.bfloat16),
        pw_b=0.01 * jax.random.normal(ks[3], (L, 1, C), jnp.float32),
        ln_w=jnp.ones((L, 1, C), jnp.float32),
        ln_b=jnp.zeros((L, 1, C), jnp.float32),
        out_w=(sc * jax.random.normal(ks[4], (L, C, C), jnp.float32)
               ).astype(jnp.bfloat16),
        out_b=0.01 * jax.random.normal(ks[5], (L, 1, C), jnp.float32),
    )


if __name__ == "__main__":
    # config: hidden_size=32, kernel_size=3, num_hidden_layers=2
    B, C, H, W = 2, 32, 8, 8
    K, NUM_LAYERS = 3, 2

    key = jax.random.PRNGKey(0)
    k_x, k_m, k_p = jax.random.split(key, 3)

    # span_states in torch layout NCHW, attention_mask (bsz, max_len, max_len)
    span_states_nchw = jax.random.normal(k_x, (B, C, H, W), jnp.float32)
    attention_mask = (jax.random.uniform(k_m, (B, H, W)) > 0.2).astype(jnp.float32)

    params = make_params(k_p, NUM_LAYERS, C, K)

    fwd = jax.jit(functools.partial(t2d_forward, kernel_size=K))

    # NCHW -> NHWC for the kernel, back to torch layout afterwards.
    x = jnp.transpose(span_states_nchw, (0, 2, 3, 1))
    out_nhwc = fwd(x, attention_mask, params)
    out_nchw = jnp.transpose(out_nhwc, (0, 3, 1, 2))

    jax.block_until_ready(out_nchw)
    assert out_nchw.shape == (B, C, H, W)
    assert bool(jnp.all(jnp.isfinite(out_nchw)))
    print("KERNEL_OK")
</pallas_src>

<mosaic_0001>
module attributes {stable_mosaic.version = 11 : i64} {
  func.func @t2d_fused_kernel(%arg0: i32, %arg1: memref<2x8x8x32xf32, #tpu.memory_space<vmem>>, %arg2: memref<2x8x8x1xf32, #tpu.memory_space<vmem>>, %arg3: memref<1x9x32xf32, #tpu.memory_space<vmem>>, %arg4: memref<1x1x32xf32, #tpu.memory_space<vmem>>, %arg5: memref<1x32x32xbf16, #tpu.memory_space<vmem>>, %arg6: memref<1x1x32xf32, #tpu.memory_space<vmem>>, %arg7: memref<1x1x32xf32, #tpu.memory_space<vmem>>, %arg8: memref<1x1x32xf32, #tpu.memory_space<vmem>>, %arg9: memref<1x32x32xbf16, #tpu.memory_space<vmem>>, %arg10: memref<1x1x32xf32, #tpu.memory_space<vmem>>, %arg11: memref<2x8x8x32xf32, #tpu.memory_space<vmem>>) attributes {dimension_semantics = [#tpu.dimension_semantics<arbitrary>], iteration_bounds = array<i64: 2>, scalar_prefetch = 0 : i64, scratch_operands = 0 : i64, tpu.core_type = #tpu.core_type<tc>, window_params = [{pipeline_mode = #tpu.pipeline_mode<synchronous>, transform_indices = @transform_0, window_bounds = array<i64: 2, 8, 8, 32>}, {pipeline_mode = #tpu.pipeline_mode<synchronous>, transform_indices = @transform_1, window_bounds = array<i64: 2, 8, 8, 1>}, {transform_indices = @transform_2, window_bounds = array<i64: 1, 9, 32>}, {transform_indices = @transform_3, window_bounds = array<i64: 1, 1, 32>}, {transform_indices = @transform_4, window_bounds = array<i64: 1, 32, 32>}, {transform_indices = @transform_5, window_bounds = array<i64: 1, 1, 32>}, {transform_indices = @transform_6, window_bounds = array<i64: 1, 1, 32>}, {transform_indices = @transform_7, window_bounds = array<i64: 1, 1, 32>}, {transform_indices = @transform_8, window_bounds = array<i64: 1, 32, 32>}, {transform_indices = @transform_9, window_bounds = array<i64: 1, 1, 32>}, {pipeline_mode = #tpu.pipeline_mode<synchronous>, transform_indices = @transform_10, window_bounds = array<i64: 2, 8, 8, 32>}]} {
    %c0_i32 = arith.constant 0 : i32
    %0 = arith.cmpi eq, %arg0, %c0_i32 : i32
    %1 = arith.extui %0 : i1 to i32
    %c0_i32_0 = arith.constant 0 : i32
    %2 = arith.cmpi ne, %1, %c0_i32_0 : i32
    scf.if %2 {
      %c0_62 = arith.constant 0 : index
      %c0_63 = arith.constant 0 : index
      %c0_64 = arith.constant 0 : index
      %c0_65 = arith.constant 0 : index
      %184 = vector.load %arg1[%c0_62, %c0_63, %c0_64, %c0_65] : memref<2x8x8x32xf32, #tpu.memory_space<vmem>>, vector<2x8x8x32xf32>
      %c0_66 = arith.constant 0 : index
      %c0_67 = arith.constant 0 : index
      %c0_68 = arith.constant 0 : index
      %c0_69 = arith.constant 0 : index
      %185 = vector.load %arg11[%c0_66, %c0_67, %c0_68, %c0_69] : memref<2x8x8x32xf32, #tpu.memory_space<vmem>>, vector<2x8x8x32xf32>
      tpu.vector_store %arg11[%c0_66, %c0_67, %c0_68, %c0_69], %184 {strides = array<i32>} : memref<2x8x8x32xf32, #tpu.memory_space<vmem>>, vector<2x8x8x32xf32>,
    } else {
    }
    %c0 = arith.constant 0 : index
    %c0_1 = arith.constant 0 : index
    %c0_2 = arith.constant 0 : index
    %c0_3 = arith.constant 0 : index
    %3 = vector.load %arg11[%c0, %c0_1, %c0_2, %c0_3] : memref<2x8x8x32xf32, #tpu.memory_space<vmem>>, vector<2x8x8x32xf32>
    %c0_4 = arith.constant 0 : index
    %c0_5 = arith.constant 0 : index
    %c0_6 = arith.constant 0 : index
    %c0_7 = arith.constant 0 : index
    %4 = vector.load %arg2[%c0_4, %c0_5, %c0_6, %c0_7] : memref<2x8x8x1xf32, #tpu.memory_space<vmem>>, vector<2x8x8x1xf32>
    %cst = arith.constant 0.000000e+00 : f32
    %5 = vector.broadcast %cst : f32 to vector<2x8x8x1xf32>
    %6 = arith.cmpf oeq, %4, %5 : vector<2x8x8x1xf32>
    %cst_8 = arith.constant 0.000000e+00 : f32
    %7 = vector.shape_cast %6 : vector<2x8x8x1xi1> to vector<2x8x8x1xi1>
    %8 = vector.broadcast %7 : vector<2x8x8x1xi1> to vector<2x8x8x32xi1>
    %9 = vector.broadcast %cst_8 : f32 to vector<2x8x8x32xf32>
    %10 = arith.select %8, %9, %3 : vector<2x8x8x32xi1>, vector<2x8x8x32xf32>
    %11 = tpu.iota {dimensions = array<i32: 0>} : vector<8x32xi32>
    %c1_i32 = arith.constant 1 : i32
    %12 = tpu.dynamic_rotate %10 by %c1_i32 dim 2 : vector<2x8x8x32xf32>, i32 -> vector<2x8x8x32xf32>
    %c-1_i32 = arith.constant -1 : i32
    %13 = vector.broadcast %c-1_i32 : i32 to vector<8x32xi32>
    %14 = arith.addi %11, %13 : vector<8x32xi32>
    %c0_i32_9 = arith.constant 0 : i32
    %15 = vector.broadcast %c0_i32_9 : i32 to vector<8x32xi32>
    %16 = arith.cmpi sge, %14, %15 : vector<8x32xi32>
    %c-1_i32_10 = arith.constant -1 : i32
    %17 = vector.broadcast %c-1_i32_10 : i32 to vector<8x32xi32>
    %18 = arith.addi %11, %17 : vector<8x32xi32>
    %c8_i32 = arith.constant 8 : i32
    %19 = vector.broadcast %c8_i32 : i32 to vector<8x32xi32>
    %20 = arith.cmpi slt, %18, %19 : vector<8x32xi32>
    %21 = arith.andi %16, %20 : vector<8x32xi1>
    %cst_11 = arith.constant 0.000000e+00 : f32
    %22 = vector.shape_cast %21 : vector<8x32xi1> to vector<1x1x8x32xi1>
    %23 = vector.broadcast %22 : vector<1x1x8x32xi1> to vector<2x8x8x32xi1>
    %24 = vector.broadcast %cst_11 : f32 to vector<2x8x8x32xf32>
    %25 = arith.select %23, %12, %24 : vector<2x8x8x32xi1>, vector<2x8x8x32xf32>
    %c7_i32 = arith.constant 7 : i32
    %26 = tpu.dynamic_rotate %10 by %c7_i32 dim 2 : vector<2x8x8x32xf32>, i32 -> vector<2x8x8x32xf32>
    %c1_i32_12 = arith.constant 1 : i32
    %27 = vector.broadcast %c1_i32_12 : i32 to vector<8x32xi32>
    %28 = arith.addi %11, %27 : vector<8x32xi32>
    %c0_i32_13 = arith.constant 0 : i32
    %29 = vector.broadcast %c0_i32_13 : i32 to vector<8x32xi32>
    %30 = arith.cmpi sge, %28, %29 : vector<8x32xi32>
    %c1_i32_14 = arith.constant 1 : i32
    %31 = vector.broadcast %c1_i32_14 : i32 to vector<8x32xi32>
    %32 = arith.addi %11, %31 : vector<8x32xi32>
    %c8_i32_15 = arith.constant 8 : i32
    %33 = vector.broadcast %c8_i32_15 : i32 to vector<8x32xi32>
    %34 = arith.cmpi slt, %32, %33 : vector<8x32xi32>
    %35 = arith.andi %30, %34 : vector<8x32xi1>
    %cst_16 = arith.constant 0.000000e+00 : f32
    %36 = vector.shape_cast %35 : vector<8x32xi1> to vector<1x1x8x32xi1>
    %37 = vector.broadcast %36 : vector<1x1x8x32xi1> to vector<2x8x8x32xi1>
    %38 = vector.broadcast %cst_16 : f32 to vector<2x8x8x32xf32>
    %39 = arith.select %37, %26, %38 : vector<2x8x8x32xi1>, vector<2x8x8x32xf32>
    %c0_17 = arith.constant 0 : index
    %c0_18 = arith.constant 0 : index
    %c0_19 = arith.constant 0 : index
    %40 = vector.load %arg3[%c0_17, %c0_18, %c0_19] : memref<1x9x32xf32, #tpu.memory_space<vmem>>, vector<1x9x32xf32>
    %41 = vector.shape_cast %40 : vector<1x9x32xf32> to vector<9x32xf32>
    %c0_20 = arith.constant 0 : index
    %c0_21 = arith.constant 0 : index
    %c0_22 = arith.constant 0 : index
    %42 = vector.load %arg4[%c0_20, %c0_21, %c0_22] : memref<1x1x32xf32, #tpu.memory_space<vmem>>, vector<1x1x32xf32>
    %43 = vector.shape_cast %42 : vector<1x1x32xf32> to vector<1x32xf32>
    %44 = vector.shape_cast %43 : vector<1x32xf32> to vector<1x1x1x32xf32>
    %45 = vector.broadcast %44 : vector<1x1x1x32xf32> to vector<2x8x8x32xf32>
    %cst_23 = arith.constant 0.000000e+00 : f32
    %46 = vector.broadcast %cst_23 : f32 to vector<2x1x8x32xf32>
    %47 = vector.extract_strided_slice %25 {offsets = [0, 0, 0, 0], sizes = [2, 7, 8, 32], strides = [1, 1, 1, 1]} : vector<2x8x8x32xf32> to vector<2x7x8x32xf32>
    %48 = tpu.concatenate %46, %47 in 1 : vector<2x1x8x32xf32>, vector<2x7x8x32xf32> -> vector<2x8x8x32xf32>
    %49 = vector.extract_strided_slice %41 {offsets = [0, 0], sizes = [1, 32], strides = [1, 1]} : vector<9x32xf32> to vector<1x32xf32>
    %50 = vector.shape_cast %49 : vector<1x32xf32> to vector<32xf32>
    %51 = vector.shape_cast %50 : vector<32xf32> to vector<1x1x1x32xf32>
    %52 = vector.broadcast %51 : vector<1x1x1x32xf32> to vector<2x8x8x32xf32>
    %53 = arith.mulf %48, %52 : vector<2x8x8x32xf32>
    %54 = arith.addf %45, %53 : vector<2x8x8x32xf32>
    %cst_24 = arith.constant 0.000000e+00 : f32
    %55 = vector.broadcast %cst_24 : f32 to vector<2x1x8x32xf32>
    %56 = vector.extract_strided_slice %10 {offsets = [0, 0, 0, 0], sizes = [2, 7, 8, 32], strides = [1, 1, 1, 1]} : vector<2x8x8x32xf32> to vector<2x7x8x32xf32>
    %57 = tpu.concatenate %55, %56 in 1 : vector<2x1x8x32xf32>, vector<2x7x8x32xf32> -> vector<2x8x8x32xf32>
    %58 = vector.extract_strided_slice %41 {offsets = [1, 0], sizes = [1, 32], strides = [1, 1]} : vector<9x32xf32> to vector<1x32xf32>
    %59 = vector.shape_cast %58 : vector<1x32xf32> to vector<32xf32>
    %60 = vector.shape_cast %59 : vector<32xf32> to vector<1x1x1x32xf32>
    %61 = vector.broadcast %60 : vector<1x1x1x32xf32> to vector<2x8x8x32xf32>
    %62 = arith.mulf %57, %61 : vector<2x8x8x32xf32>
    %63 = arith.addf %54, %62 : vector<2x8x8x32xf32>
    %cst_25 = arith.constant 0.000000e+00 : f32
    %64 = vector.broadcast %cst_25 : f32 to vector<2x1x8x32xf32>
    %65 = vector.extract_strided_slice %39 {offsets = [0, 0, 0, 0], sizes = [2, 7, 8, 32], strides = [1, 1, 1, 1]} : vector<2x8x8x32xf32> to vector<2x7x8x32xf32>
    %66 = tpu.concatenate %64, %65 in 1 : vector<2x1x8x32xf32>, vector<2x7x8x32xf32> -> vector<2x8x8x32xf32>
    %67 = vector.extract_strided_slice %41 {offsets = [2, 0], sizes = [1, 32], strides = [1, 1]} : vector<9x32xf32> to vector<1x32xf32>
    %68 = vector.shape_cast %67 : vector<1x32xf32> to vector<32xf32>
    %69 = vector.shape_cast %68 : vector<32xf32> to vector<1x1x1x32xf32>
    %70 = vector.broadcast %69 : vector<1x1x1x32xf32> to vector<2x8x8x32xf32>
    %71 = arith.mulf %66, %70 : vector<2x8x8x32xf32>
    %72 = arith.addf %63, %71 : vector<2x8x8x32xf32>
    %73 = vector.extract_strided_slice %41 {offsets = [3, 0], sizes = [1, 32], strides = [1, 1]} : vector<9x32xf32> to vector<1x32xf32>
    %74 = vector.shape_cast %73 : vector<1x32xf32> to vector<32xf32>
    %75 = vector.shape_cast %74 : vector<32xf32> to vector<1x1x1x32xf32>
    %76 = vector.broadcast %75 : vector<1x1x1x32xf32> to vector<2x8x8x32xf32>
    %77 = arith.mulf %25, %76 : vector<2x8x8x32xf32>
    %78 = arith.addf %72, %77 : vector<2x8x8x32xf32>
    %79 = vector.extract_strided_slice %41 {offsets = [4, 0], sizes = [1, 32], strides = [1, 1]} : vector<9x32xf32> to vector<1x32xf32>
    %80 = vector.shape_cast %79 : vector<1x32xf32> to vector<32xf32>
    %81 = vector.shape_cast %80 : vector<32xf32> to vector<1x1x1x32xf32>
    %82 = vector.broadcast %81 : vector<1x1x1x32xf32> to vector<2x8x8x32xf32>
    %83 = arith.mulf %10, %82 : vector<2x8x8x32xf32>
    %84 = arith.addf %78, %83 : vector<2x8x8x32xf32>
    %85 = vector.extract_strided_slice %41 {offsets = [5, 0], sizes = [1, 32], strides = [1, 1]} : vector<9x32xf32> to vector<1x32xf32>
    %86 = vector.shape_cast %85 : vector<1x32xf32> to vector<32xf32>
    %87 = vector.shape_cast %86 : vector<32xf32> to vector<1x1x1x32xf32>
    %88 = vector.broadcast %87 : vector<1x1x1x32xf32> to vector<2x8x8x32xf32>
    %89 = arith.mulf %39, %88 : vector<2x8x8x32xf32>
    %90 = arith.addf %84, %89 : vector<2x8x8x32xf32>
    %91 = vector.extract_strided_slice %25 {offsets = [0, 1, 0, 0], sizes = [2, 7, 8, 32], strides = [1, 1, 1, 1]} : vector<2x8x8x32xf32> to vector<2x7x8x32xf32>
    %cst_26 = arith.constant 0.000000e+00 : f32
    %92 = vector.broadcast %cst_26 : f32 to vector<2x1x8x32xf32>
    %93 = tpu.concatenate %91, %92 in 1 : vector<2x7x8x32xf32>, vector<2x1x8x32xf32> -> vector<2x8x8x32xf32>
    %94 = vector.extract_strided_slice %41 {offsets = [6, 0], sizes = [1, 32], strides = [1, 1]} : vector<9x32xf32> to vector<1x32xf32>
    %95 = vector.shape_cast %94 : vector<1x32xf32> to vector<32xf32>
    %96 = vector.shape_cast %95 : vector<32xf32> to vector<1x1x1x32xf32>
    %97 = vector.broadcast %96 : vector<1x1x1x32xf32> to vector<2x8x8x32xf32>
    %98 = arith.mulf %93, %97 : vector<2x8x8x32xf32>
    %99 = arith.addf %90, %98 : vector<2x8x8x32xf32>
    %100 = vector.extract_strided_slice %10 {offsets = [0, 1, 0, 0], sizes = [2, 7, 8, 32], strides = [1, 1, 1, 1]} : vector<2x8x8x32xf32> to vector<2x7x8x32xf32>
    %cst_27 = arith.constant 0.000000e+00 : f32
    %101 = vector.broadcast %cst_27 : f32 to vector<2x1x8x32xf32>
    %102 = tpu.concatenate %100, %101 in 1 : vector<2x7x8x32xf32>, vector<2x1x8x32xf32> -> vector<2x8x8x32xf32>
    %103 = vector.extract_strided_slice %41 {offsets = [7, 0], sizes = [1, 32], strides = [1, 1]} : vector<9x32xf32> to vector<1x32xf32>
    %104 = vector.shape_cast %103 : vector<1x32xf32> to vector<32xf32>
    %105 = vector.shape_cast %104 : vector<32xf32> to vector<1x1x1x32xf32>
    %106 = vector.broadcast %105 : vector<1x1x1x32xf32> to vector<2x8x8x32xf32>
    %107 = arith.mulf %102, %106 : vector<2x8x8x32xf32>
    %108 = arith.addf %99, %107 : vector<2x8x8x32xf32>
    %109 = vector.extract_strided_slice %39 {offsets = [0, 1, 0, 0], sizes = [2, 7, 8, 32], strides = [1, 1, 1, 1]} : vector<2x8x8x32xf32> to vector<2x7x8x32xf32>
    %cst_28 = arith.constant 0.000000e+00 : f32
    %110 = vector.broadcast %cst_28 : f32 to vector<2x1x8x32xf32>
    %111 = tpu.concatenate %109, %110 in 1 : vector<2x7x8x32xf32>, vector<2x1x8x32xf32> -> vector<2x8x8x32xf32>
    %112 = vector.extract_strided_slice %41 {offsets = [8, 0], sizes = [1, 32], strides = [1, 1]} : vector<9x32xf32> to vector<1x32xf32>
    %113 = vector.shape_cast %112 : vector<1x32xf32> to vector<32xf32>
    %114 = vector.shape_cast %113 : vector<32xf32> to vector<1x1x1x32xf32>
    %115 = vector.broadcast %114 : vector<1x1x1x32xf32> to vector<2x8x8x32xf32>
    %116 = arith.mulf %111, %115 : vector<2x8x8x32xf32>
    %117 = arith.addf %108, %116 : vector<2x8x8x32xf32>
    %118 = vector.shape_cast %117 : vector<2x8x8x32xf32> to vector<128x32xf32>
    %119 = arith.truncf %118 : vector<128x32xf32> to vector<128x32xbf16>
    %c0_29 = arith.constant 0 : index
    %c0_30 = arith.constant 0 : index
    %c0_31 = arith.constant 0 : index
    %120 = vector.load %arg5[%c0_29, %c0_30, %c0_31] : memref<1x32x32xbf16, #tpu.memory_space<vmem>>, vector<1x32x32xbf16>
    %121 = vector.shape_cast %120 : vector<1x32x32xbf16> to vector<32x32xbf16>
    %cst_32 = arith.constant dense<0.000000e+00> : vector<128x32xf32>
    %122 = tpu.matmul %119, %121, %cst_32 {dimension_numbers = #tpu.dot_dimension_numbers<[1], [0], [0], [1], [0, 0, 1, 1], [], []>} : vector<128x32xbf16>, vector<32x32xbf16>, vector<128x32xf32> -> vector<128x32xf32>
    %123 = vector.shape_cast %122 : vector<128x32xf32> to vector<2x8x8x32xf32>
    %c0_33 = arith.constant 0 : index
    %c0_34 = arith.constant 0 : index
    %c0_35 = arith.constant 0 : index
    %124 = vector.load %arg6[%c0_33, %c0_34, %c0_35] : memref<1x1x32xf32, #tpu.memory_space<vmem>>, vector<1x1x32xf32>
    %125 = vector.shape_cast %124 : vector<1x1x32xf32> to vector<1x32xf32>
    %126 = vector.shape_cast %125 : vector<1x32xf32> to vector<1x1x1x32xf32>
    %127 = vector.broadcast %126 : vector<1x1x1x32xf32> to vector<2x8x8x32xf32>
    %128 = arith.addf %123, %127 : vector<2x8x8x32xf32>
    %129 = vector.broadcast %4 : vector<2x8x8x1xf32> to vector<2x8x8x32xf32>
    %130 = arith.mulf %128, %129 : vector<2x8x8x32xf32>
    %131 = arith.mulf %130, %10 : vector<2x8x8x32xf32>
    %132 = arith.addf %131, %3 : vector<2x8x8x32xf32>
    %cst_36 = arith.constant dense<0.000000e+00> : vector<2x8x8xf32>
    %133 = vector.multi_reduction <add>, %132, %cst_36 [3] : vector<2x8x8x32xf32> to vector<2x8x8xf32>
    %134 = vector.shape_cast %133 : vector<2x8x8xf32> to vector<2x8x8x1xf32>
    %cst_37 = arith.constant 3.125000e-02 : f32
    %135 = vector.broadcast %cst_37 : f32 to vector<2x8x8x1xf32>
    %136 = arith.mulf %134, %135 : vector<2x8x8x1xf32>
    %137 = vector.broadcast %136 : vector<2x8x8x1xf32> to vector<2x8x8x32xf32>
    %138 = arith.subf %132, %137 : vector<2x8x8x32xf32>
    %139 = arith.mulf %138, %138 : vector<2x8x8x32xf32>
    %cst_38 = arith.constant dense<0.000000e+00> : vector<2x8x8xf32>
    %140 = vector.multi_reduction <add>, %139, %cst_38 [3] : vector<2x8x8x32xf32> to vector<2x8x8xf32>
    %141 = vector.shape_cast %140 : vector<2x8x8xf32> to vector<2x8x8x1xf32>
    %cst_39 = arith.constant 3.125000e-02 : f32
    %142 = vector.broadcast %cst_39 : f32 to vector<2x8x8x1xf32>
    %143 = arith.mulf %141, %142 : vector<2x8x8x1xf32>
    %cst_40 = arith.constant 9.99999997E-7 : f32
    %144 = vector.broadcast %cst_40 : f32 to vector<2x8x8x1xf32>
    %145 = arith.addf %143, %144 : vector<2x8x8x1xf32>
    %146 = math.rsqrt %145 : vector<2x8x8x1xf32>
    %147 = vector.broadcast %146 : vector<2x8x8x1xf32> to vector<2x8x8x32xf32>
    %148 = arith.mulf %138, %147 : vector<2x8x8x32xf32>
    %c0_41 = arith.constant 0 : index
    %c0_42 = arith.constant 0 : index
    %c0_43 = arith.constant 0 : index
    %149 = vector.load %arg7[%c0_41, %c0_42, %c0_43] : memref<1x1x32xf32, #tpu.memory_space<vmem>>, vector<1x1x32xf32>
    %150 = vector.shape_cast %149 : vector<1x1x32xf32> to vector<1x32xf32>
    %151 = vector.shape_cast %150 : vector<1x32xf32> to vector<1x1x1x32xf32>
    %152 = vector.broadcast %151 : vector<1x1x1x32xf32> to vector<2x8x8x32xf32>
    %153 = arith.mulf %148, %152 : vector<2x8x8x32xf32>
    %c0_44 = arith.constant 0 : index
    %c0_45 = arith.constant 0 : index
    %c0_46 = arith.constant 0 : index
    %154 = vector.load %arg8[%c0_44, %c0_45, %c0_46] : memref<1x1x32xf32, #tpu.memory_space<vmem>>, vector<1x1x32xf32>
    %155 = vector.shape_cast %154 : vector<1x1x32xf32> to vector<1x32xf32>
    %156 = vector.shape_cast %155 : vector<1x32xf32> to vector<1x1x1x32xf32>
    %157 = vector.broadcast %156 : vector<1x1x1x32xf32> to vector<2x8x8x32xf32>
    %158 = arith.addf %153, %157 : vector<2x8x8x32xf32>
    %159 = arith.addf %158, %3 : vector<2x8x8x32xf32>
    %160 = vector.shape_cast %159 : vector<2x8x8x32xf32> to vector<128x32xf32>
    %161 = arith.truncf %160 : vector<128x32xf32> to vector<128x32xbf16>
    %c0_47 = arith.constant 0 : index
    %c0_48 = arith.constant 0 : index
    %c0_49 = arith.constant 0 : index
    %162 = vector.load %arg9[%c0_47, %c0_48, %c0_49] : memref<1x32x32xbf16, #tpu.memory_space<vmem>>, vector<1x32x32xbf16>
    %163 = vector.shape_cast %162 : vector<1x32x32xbf16> to vector<32x32xbf16>
    %cst_50 = arith.constant dense<0.000000e+00> : vector<128x32xf32>
    %164 = tpu.matmul %161, %163, %cst_50 {dimension_numbers = #tpu.dot_dimension_numbers<[1], [0], [0], [1], [0, 0, 1, 1], [], []>} : vector<128x32xbf16>, vector<32x32xbf16>, vector<128x32xf32> -> vector<128x32xf32>
    %c0_51 = arith.constant 0 : index
    %c0_52 = arith.constant 0 : index
    %c0_53 = arith.constant 0 : index
    %165 = vector.load %arg10[%c0_51, %c0_52, %c0_53] : memref<1x1x32xf32, #tpu.memory_space<vmem>>, vector<1x1x32xf32>
    %166 = vector.shape_cast %165 : vector<1x1x32xf32> to vector<1x32xf32>
    %167 = vector.broadcast %166 : vector<1x32xf32> to vector<128x32xf32>
    %168 = arith.addf %164, %167 : vector<128x32xf32>
    %cst_54 = arith.constant 5.000000e-01 : f32
    %169 = vector.broadcast %cst_54 : f32 to vector<128x32xf32>
    %170 = arith.mulf %169, %168 : vector<128x32xf32>
    %171 = arith.mulf %168, %168 : vector<128x32xf32>
    %172 = arith.mulf %171, %168 : vector<128x32xf32>
    %cst_55 = arith.constant 4.471500e-02 : f32
    %173 = vector.broadcast %cst_55 : f32 to vector<128x32xf32>
    %174 = arith.mulf %173, %172 : vector<128x32xf32>
    %175 = arith.addf %168, %174 : vector<128x32xf32>
    %cst_56 = arith.constant 0.797884583 : f32
    %176 = vector.broadcast %cst_56 : f32 to vector<128x32xf32>
    %177 = arith.mulf %176, %175 : vector<128x32xf32>
    %178 = math.tanh %177 : vector<128x32xf32>
    %cst_57 = arith.constant 1.000000e+00 : f32
    %179 = vector.broadcast %cst_57 : f32 to vector<128x32xf32>
    %180 = arith.addf %179, %178 : vector<128x32xf32>
    %181 = arith.mulf %170, %180 : vector<128x32xf32>
    %182 = vector.shape_cast %181 : vector<128x32xf32> to vector<2x8x8x32xf32>
    %c0_58 = arith.constant 0 : index
    %c0_59 = arith.constant 0 : index
    %c0_60 = arith.constant 0 : index
    %c0_61 = arith.constant 0 : index
    %183 = vector.load %arg11[%c0_58, %c0_59, %c0_60, %c0_61] : memref<2x8x8x32xf32, #tpu.memory_space<vmem>>, vector<2x8x8x32xf32>
    tpu.vector_store %arg11[%c0_58, %c0_59, %c0_60, %c0_61], %182 {strides = array<i32>} : memref<2x8x8x32xf32, #tpu.memory_space<vmem>>, vector<2x8x8x32xf32>,
    return
  }
  func.func @transform_0(%arg0: i32) -> (i32, i32, i32, i32) {
    %c0_i32 = arith.constant 0 : i32
    %c0_i32_0 = arith.constant 0 : i32
    %c0_i32_1 = arith.constant 0 : i32
    %c0_i32_2 = arith.constant 0 : i32
    %c0_i32_3 = arith.constant 0 : i32
    return %c0_i32, %c0_i32_0, %c0_i32_1, %c0_i32_2 : i32, i32, i32, i32
  }
  func.func @transform_1(%arg0: i32) -> (i32, i32, i32, i32) {
    %c0_i32 = arith.constant 0 : i32
    %c0_i32_0 = arith.constant 0 : i32
    %c0_i32_1 = arith.constant 0 : i32
    %c0_i32_2 = arith.constant 0 : i32
    %c0_i32_3 = arith.constant 0 : i32
    return %c0_i32, %c0_i32_0, %c0_i32_1, %c0_i32_2 : i32, i32, i32, i32
  }
  func.func @transform_2(%arg0: i32) -> (i32, i32, i32) {
    %c0_i32 = arith.constant 0 : i32
    %c0_i32_0 = arith.constant 0 : i32
    %c0_i32_1 = arith.constant 0 : i32
    return %arg0, %c0_i32, %c0_i32_0 : i32, i32, i32
  }
  func.func @transform_3(%arg0: i32) -> (i32, i32, i32) {
    %c0_i32 = arith.constant 0 : i32
    %c0_i32_0 = arith.constant 0 : i32
    %c0_i32_1 = arith.constant 0 : i32
    return %arg0, %c0_i32, %c0_i32_0 : i32, i32, i32
  }
  func.func @transform_4(%arg0: i32) -> (i32, i32, i32) {
    %c0_i32 = arith.constant 0 : i32
    %c0_i32_0 = arith.constant 0 : i32
    %c0_i32_1 = arith.constant 0 : i32
    return %arg0, %c0_i32, %c0_i32_0 : i32, i32, i32
  }
  func.func @transform_5(%arg0: i32) -> (i32, i32, i32) {
    %c0_i32 = arith.constant 0 : i32
    %c0_i32_0 = arith.constant 0 : i32
    %c0_i32_1 = arith.constant 0 : i32
    return %arg0, %c0_i32, %c0_i32_0 : i32, i32, i32
  }
  func.func @transform_6(%arg0: i32) -> (i32, i32, i32) {
    %c0_i32 = arith.constant 0 : i32
    %c0_i32_0 = arith.constant 0 : i32
    %c0_i32_1 = arith.constant 0 : i32
    return %arg0, %c0_i32, %c0_i32_0 : i32, i32, i32
  }
  func.func @transform_7(%arg0: i32) -> (i32, i32, i32) {
    %c0_i32 = arith.constant 0 : i32
    %c0_i32_0 = arith.constant 0 : i32
    %c0_i32_1 = arith.constant 0 : i32
    return %arg0, %c0_i32, %c0_i32_0 : i32, i32, i32
  }
  func.func @transform_8(%arg0: i32) -> (i32, i32, i32) {
    %c0_i32 = arith.constant 0 : i32
    %c0_i32_0 = arith.constant 0 : i32
    %c0_i32_1 = arith.constant 0 : i32
    return %arg0, %c0_i32, %c0_i32_0 : i32, i32, i32
  }
  func.func @transform_9(%arg0: i32) -> (i32, i32, i32) {
    %c0_i32 = arith.constant 0 : i32
    %c0_i32_0 = arith.constant 0 : i32
    %c0_i32_1 = arith.constant 0 : i32
    return %arg0, %c0_i32, %c0_i32_0 : i32, i32, i32
  }
  func.func @transform_10(%arg0: i32) -> (i32, i32, i32, i32) {
    %c0_i32 = arith.constant 0 : i32
    %c0_i32_0 = arith.constant 0 : i32
    %c0_i32_1 = arith.constant 0 : i32
    %c0_i32_2 = arith.constant 0 : i32
    %c0_i32_3 = arith.constant 0 : i32
    return %c0_i32, %c0_i32_0, %c0_i32_1, %c0_i32_2 : i32, i32, i32, i32
  }
}

</mosaic_0001>

<bundles_post_ra>
// kernel: t2d_forward.1
= control target key start
LH: loop header
LB: loop body
LE: loop exit
PB: predicated region body
PF: predicated region fallthrough
CT: control target
= control target key end

     0   :  { %s3633_s0 = inlined_call_operand.vmem [shape: f32[2,8,8,32], index: 0, kind: input, shape index: {}]   ;;  %s3634_s1 = inlined_call_operand.vmem [shape: f32[2,8,8,1], index: 1, kind: input, shape index: {}]   ;;  %s3635_s2 = inlined_call_operand.vmem [shape: f32[2,9,32], index: 2, kind: input, shape index: {}]   ;;  %s3636_s3 = inlined_call_operand.vmem [shape: f32[2,1,32], index: 3, kind: input, shape index: {}]   ;;  %s3637_s4 = inlined_call_operand.vmem [shape: bf16[2,32,32], index: 4, kind: input, shape index: {}]   ;;  %s3638_s5 = inlined_call_operand.vmem [shape: f32[2,1,32], index: 5, kind: input, shape index: {}]   ;;  %s3639_s6 = inlined_call_operand.vmem [shape: f32[2,1,32], index: 6, kind: input, shape index: {}]   ;;  %s3640_s7 = inlined_call_operand.vmem [shape: f32[2,1,32], index: 7, kind: input, shape index: {}]   ;;  %s3641_s8 = inlined_call_operand.vmem [shape: bf16[2,32,32], index: 8, kind: input, shape index: {}]   ;;  %s3642_s9 = inlined_call_operand.vmem [shape: f32[2,1,32], index: 9, kind: input, shape index: {}]   ;;  %s3643_s10 = inlined_call_operand.hbm [shape: f32[2,8,8,32], index: 10, kind: output, shape index: {}]  }
   0x1   :  { %3687 = sst [smem:[#allocation72_spill]] %s3635_s2 }
   0x2   :  { %15 = vsyncpa [#allocation3], 0  ;;  %s2341_s13 = smov 0  }
   0x3 LB: > { %s2347_s14 = sadd.s32 4294967295, %s2280_s13   ;;  %p2039_p0 = scmp.ge.s32.totalorder %s2280_s13, 1  ;;  %s2280_s13 = sphi %s2341_s13, %s21_s13  }
   0x4   : > { %p368_p1 = scmp.lt.s32.totalorder %s2280_s13, 3 }
   0x6   : > { %p369_p2 = pnand %p2039_p0, %p368_p1 }
   0x8   : > { %372 = sbr.rel (%p369_p2) target bundleno = 1075 (0x433), region = 60 }
   0xf   : > { %p426_p3 = scmp.lt.s32.totalorder %s2347_s14, 1  ;;  %s3688_s2 = sld [smem:[#allocation72_spill]] }
  0x10   : > { %p2046_p4 = scmp.ne.s32.totalorder %s2347_s14, 0 }
  0x11   : > { %s2353_s15 = scalar_select %p426_p3, %s2347_s14, 1 }
  0x12   : > { %460 = sbr.rel (%p2046_p4) target bundleno = 27 (0x1b), region = 64  ;;  %v461_v0 = vld [vmem:[%s3633_s0] sm:$0xff] (!%p2046_p4)  ;;  %vm477_vm0 = vcmask (!%p2046_p4), 261120   ;;  %v462_v1 = vld [vmem:[%s3633_s0 + $0x8] sm:$0xff] (!%p2046_p4)  ;;  %v463_v2 = vld [vmem:[%s3633_s0 + $0x10] sm:$0xff] (!%p2046_p4) }
  0x13   : > { %s2077_s16 = sshll.u32 %s2353_s15, 4  ;;  %s441_s28 = scalar_lea.vmem %s3638_s5, %s2353_s15  ;;  %478 = vst.msk [vmem:[#allocation2] sm:$0xff] (!%p2046_p4), %vm477_vm0, %v461_v0  ;;  %479 = vst.msk [vmem:[#allocation2 + $0x8] sm:$0xff] (!%p2046_p4), %vm477_vm0, %v462_v1  ;;  %v464_v3 = vld [vmem:[%s3633_s0 + $0x18] sm:$0xff] (!%p2046_p4)  ;;  %v465_v4 = vld [vmem:[%s3633_s0 + $0x20] sm:$0xff] (!%p2046_p4) }
  0x14   : > { %s2368_s25 = scalar_lea.vmem %s3637_s4, %s2077_s16  ;;  %s444_s11 = scalar_lea.vmem %s3639_s6, %s2353_s15  ;;  %480 = vst.msk [vmem:[#allocation2 + $0x10] sm:$0xff] (!%p2046_p4), %vm477_vm0, %v463_v2  ;;  %v466_v5 = vld [vmem:[%s3633_s0 + $0x28] sm:$0xff] (!%p2046_p4)  ;;  %481 = vst.msk [vmem:[#allocation2 + $0x18] sm:$0xff] (!%p2046_p4), %vm477_vm0, %v464_v3  ;;  %v467_v6 = vld [vmem:[%s3633_s0 + $0x30] sm:$0xff] (!%p2046_p4) }
  0x15   : > { %s2363_s22 = scalar_lea.vmem %s3688_s2, %s2077_s16  ;;  %s447_s18 = scalar_lea.vmem %s3640_s7, %s2353_s15  ;;  %482 = vst.msk [vmem:[#allocation2 + $0x20] sm:$0xff] (!%p2046_p4), %vm477_vm0, %v465_v4  ;;  %483 = vst.msk [vmem:[#allocation2 + $0x28] sm:$0xff] (!%p2046_p4), %vm477_vm0, %v466_v5  ;;  %v468_v7 = vld [vmem:[%s3633_s0 + $0x38] sm:$0xff] (!%p2046_p4)  ;;  %v469_v8 = vld [vmem:[%s3633_s0 + $0x40] sm:$0xff] (!%p2046_p4) }
  0x16   : > { %s2385_s19 = scalar_lea.vmem %s3641_s8, %s2077_s16  ;;  %s455_s2 = scalar_lea.vmem %s3642_s9, %s2353_s15  ;;  %484 = vst.msk [vmem:[#allocation2 + $0x30] sm:$0xff] (!%p2046_p4), %vm477_vm0, %v467_v6  ;;  %485 = vst.msk [vmem:[#allocation2 + $0x38] sm:$0xff] (!%p2046_p4), %vm477_vm0, %v468_v7  ;;  %v470_v9 = vld [vmem:[%s3633_s0 + $0x48] sm:$0xff] (!%p2046_p4)  ;;  %v471_v10 = vld [vmem:[%s3633_s0 + $0x50] sm:$0xff] (!%p2046_p4) }
  0x17   : > { %486 = vst.msk [vmem:[#allocation2 + $0x40] sm:$0xff] (!%p2046_p4), %vm477_vm0, %v469_v8  ;;  %v472_v11 = vld [vmem:[%s3633_s0 + $0x58] sm:$0xff] (!%p2046_p4)  ;;  %487 = vst.msk [vmem:[#allocation2 + $0x48] sm:$0xff] (!%p2046_p4), %vm477_vm0, %v470_v9  ;;  %v473_v12 = vld [vmem:[%s3633_s0 + $0x60] sm:$0xff] (!%p2046_p4) }
  0x18   : > { %488 = vst.msk [vmem:[#allocation2 + $0x50] sm:$0xff] (!%p2046_p4), %vm477_vm0, %v471_v10  ;;  %489 = vst.msk [vmem:[#allocation2 + $0x58] sm:$0xff] (!%p2046_p4), %vm477_vm0, %v472_v11  ;;  %v474_v13 = vld [vmem:[%s3633_s0 + $0x68] sm:$0xff] (!%p2046_p4)  ;;  %v475_v14 = vld [vmem:[%s3633_s0 + $0x70] sm:$0xff] (!%p2046_p4) }
  0x19   : > { %490 = vst.msk [vmem:[#allocation2 + $0x60] sm:$0xff] %vm477_vm0, %v473_v12  ;;  %491 = vst.msk [vmem:[#allocation2 + $0x68] sm:$0xff] %vm477_vm0, %v474_v13  ;;  %v476_v15 = vld [vmem:[%s3633_s0 + $0x78] sm:$0xff] }
  0x1a   : > { %492 = vst.msk [vmem:[#allocation2 + $0x70] sm:$0xff] %vm477_vm0, %v475_v14  ;;  %493 = vst.msk [vmem:[#allocation2 + $0x78] sm:$0xff] %vm477_vm0, %v476_v15 }
  0x1b PF: > { %v2459_v16 = vld [vmem:[%s3634_s1 + $0x10] sm:$0xff]  ;;  %v2464_v17 = vld [vmem:[%s3634_s1] sm:$0xff]  ;;  %v2469_v18 = vld [vmem:[%s3634_s1 + $0x18] sm:$0xff]  ;;  %v2282_v19 = vmov 0   ;;  %v638_v51 = vlaneseq  ;;  %s3689_s24 = scalar_lea.vmem %s3636_s3, %s2353_s15  ;;  %p2144_p5 = scmp.eq.s32.totalorder %s2347_s14, 1 }
  0x1c   : > { %2159 = vset.pattern.permute.xlu1 %v2282_v19  ;;  %2158 = vset.pattern.permute.xlu0 %v2282_v19  ;;  %vm528_vm1 = vcmp.eq.f32.partialorder %v2459_v16, 0.0  ;;  %vm526_vm2 = vcmp.eq.f32.partialorder %v2464_v17, 0.0  ;;  %vm529_vm3 = vcmp.eq.f32.partialorder %v2469_v18, 0.0  ;;  %v511_v20 = vld [vmem:[%s3634_s1 + $0x8] sm:$0xff]  ;;  %v514_v24 = vld [vmem:[%s3634_s1 + $0x20] sm:$0xff]  ;;  %v517_v27 = vld [vmem:[%s3634_s1 + $0x38] sm:$0xff] }
  0x1d   : > { %v544_v21 = vsel %vm528_vm1, 1, %v2282_v19  ;;  %v542_v22 = vsel %vm526_vm2, 1, %v2282_v19  ;;  %vm527_vm4 = vcmp.eq.f32.partialorder %v511_v20, 0.0  ;;  %v515_v23 = vld [vmem:[%s3634_s1 + $0x28] sm:$0xff]  ;;  %v545_v25 = vsel %vm529_vm3, 1, %v2282_v19  ;;  %v516_v28 = vld [vmem:[%s3634_s1 + $0x30] sm:$0xff] }
  0x1e   : > { %565 = vperm.xlu1 %2159, %v544_v21   ;;  %559 = vperm.xlu0 %2158, %v542_v22   ;;  %v543_v26 = vsel %vm527_vm4, 1, %v2282_v19  ;;  %vm531_vm5 = vcmp.eq.f32.partialorder %v515_v23, 0.0  ;;  %vm530_vm6 = vcmp.eq.f32.partialorder %v514_v24, 0.0  ;;  %vm533_vm7 = vcmp.eq.f32.partialorder %v517_v27, 0.0  ;;  %v519_v31 = vld [vmem:[%s3634_s1 + $0x48] sm:$0xff]  ;;  %v518_v32 = vld [vmem:[%s3634_s1 + $0x40] sm:$0xff] }
  0x1f   : > { %v547_v29 = vsel %vm531_vm5, 1, %v2282_v19  ;;  %v546_v30 = vsel %vm530_vm6, 1, %v2282_v19  ;;  %vm532_vm8 = vcmp.eq.f32.partialorder %v516_v28, 0.0  ;;  %v549_v33 = vsel %vm533_vm7, 1, %v2282_v19  ;;  %v521_v35 = vld [vmem:[%s3634_s1 + $0x58] sm:$0xff]  ;;  %v520_v36 = vld [vmem:[%s3634_s1 + $0x50] sm:$0xff] }
  0x20   : > { %v548_v34 = vsel %vm532_vm8, 1, %v2282_v19  ;;  %vm535_vm9 = vcmp.eq.f32.partialorder %v519_v31, 0.0  ;;  %vm534_vm10 = vcmp.eq.f32.partialorder %v518_v32, 0.0  ;;  %vm537_vm11 = vcmp.eq.f32.partialorder %v521_v35, 0.0  ;;  %v523_v39 = vld [vmem:[%s3634_s1 + $0x68] sm:$0xff]  ;;  %v522_v40 = vld [vmem:[%s3634_s1 + $0x60] sm:$0xff] }
  0x21   : > { %v551_v37 = vsel %vm535_vm9, 1, %v2282_v19  ;;  %v550_v38 = vsel %vm534_vm10, 1, %v2282_v19  ;;  %vm536_vm12 = vcmp.eq.f32.partialorder %v520_v36, 0.0  ;;  %v553_v41 = vsel %vm537_vm11, 1, %v2282_v19  ;;  %v525_v43 = vld [vmem:[%s3634_s1 + $0x78] sm:$0xff]  ;;  %v524_v44 = vld [vmem:[%s3634_s1 + $0x70] sm:$0xff] }
  0x22   : > { %568 = vperm.xlu1 %2159, %v545_v25   ;;  %562 = vperm.xlu0 %2158, %v543_v26   ;;  %v552_v42 = vsel %vm536_vm12, 1, %v2282_v19  ;;  %vm539_vm13 = vcmp.eq.f32.partialorder %v523_v39, 0.0  ;;  %vm538_vm14 = vcmp.eq.f32.partialorder %v522_v40, 0.0  ;;  %vm541_vm15 = vcmp.eq.f32.partialorder %v525_v43, 0.0  ;;  %v2160_v49 = vld [vmem:[%s2368_s25] sm:$0xff]   ;;  %v2161_v50 = vld [vmem:[%s2368_s25 + $0x8] sm:$0xff]  }
  0x23   : > { %v555_v45 = vsel %vm539_vm13, 1, %v2282_v19  ;;  %v554_v46 = vsel %vm538_vm14, 1, %v2282_v19  ;;  %vm540_vm0 = vcmp.eq.f32.partialorder %v524_v44, 0.0  ;;  %v557_v47 = vsel %vm541_vm15, 1, %v2282_v19  ;;  %2100 = vmatprep.subr.bf16.mxu0 %v2160_v49  ;;  %v716_v54 = vld [vmem:[%s2363_s22] sm:$0xff]  ;;  %v2546_v11 = vld [vmem:[#allocation2 + $0x18] sm:$0xff] }
  0x24   : > { %v556_v48 = vsel %vm540_vm0, 1, %v2282_v19  ;;  %2101 = vmatpush3.bf16.msra.mxu0 %v2160_v49  ;;  %v639_v52 = vshrl.u32 %v638_v51, 7  ;;  %v2529_v60 = vld [vmem:[%s3689_s24] ss:$0 sm:$0xff]  ;;  %3692 = vst [vmem:[#allocation7_spill] sm:$0xff] %v2546_v11  ;;  %v2548_v12 = vld [vmem:[#allocation2 + $0x10] sm:$0xff] }
  0x25   : > { %2102 = vmatprep.subr.bf16.mxu0 %v2161_v50  ;;  %v2533_v62 = vld [vmem:[#allocation2] sm:$0xff]  ;;  %3693 = vst [vmem:[#allocation8_spill] sm:$0xff] %v2548_v12 }
  0x26   : > { %574 = vperm.xlu1 %2159, %v547_v29   ;;  %571 = vperm.xlu0 %2158, %v546_v30   ;;  %v727_v53 = vsub.s32 0, %v639_v52  ;;  %v761_v55 = vsub.s32 1, %v639_v52  ;;  %v795_v59 = vsub.s32 2, %v639_v52  ;;  %v2531_v61 = vadd.s32 4294967295, %v639_v52  ;;  %3690 = vst [vmem:[#allocation5_spill] sm:$0xff] %v2533_v62 }
  0x27   : > { %v829_v4 = vsub.s32 3, %v639_v52  ;;  %v865_v5 = vsub.s32 4, %v639_v52  ;;  %v937_v7 = vsub.s32 6, %v639_v52  ;;  %v2543_v8 = vadd.s32 1, %v639_v52 }
  0x28   : > { %2103 = vmatpush3.bf16.msra.mxu0 %v2161_v50  ;;  %v2519_v56 = vrot.slane %v716_v54, %v727_v53  ;;  %v2521_v57 = vrot.slane %v716_v54, %v761_v55  ;;  %v2537_v2 = vrot.slane %v716_v54, %v795_v59  ;;  %vm657_vm2 = vcmp.ge.s32.totalorder %v2531_v61, 0  ;;  %v2616_v53 = vld [vmem:[#allocation2 + $0x8] sm:$0xff] }
  0x29   : > { %v972_v10 = vsub.s32 7, %v639_v52  ;;  %v901_v15 = vsub.s32 5, %v639_v52  ;;  %v2557_v21 = vrot.slane %v716_v54, %v937_v7  ;;  %vm696_vm5 = vcmp.lt.s32.totalorder %v2543_v8, 8  ;;  %3700 = vst [vmem:[#allocation15_spill] sm:$0xff] %v2616_v53 }
  0x2a   : > { %580 = vperm.xlu1 %2159, %v549_v33   ;;  %577 = vperm.xlu0 %2158, %v548_v34   ;;  %v729_v58 = vmul.f32 0.0, %v2519_v56  ;;  %v763_v1 = vmul.f32 0.0, %v2521_v57  ;;  %v797_v14 = vmul.f32 0.0, %v2537_v2  ;;  %v2579_v33 = vld [vmem:[%s2363_s22 + $0x8] ss:$0 sm:$0xff] }
  0x2b   : > { %v2566_v25 = vrot.slane %v716_v54, %v972_v10  ;;  %v2582_v34 = vmul.f32 0.0, %v2557_v21 }
  0x2c   : > { %v744_v0 = vadd.f32 %v2529_v60, %v729_v58 }
  0x2d   : > { %3695 = vst [vmem:[#allocation10_spill] sm:$0xff] %v2582_v34 }
  0x2e   : > { %586 = vperm.xlu1 %2159, %v551_v37   ;;  %583 = vperm.xlu0 %2158, %v550_v38   ;;  %v778_v13 = vadd.f32 %v763_v1, %v744_v0 }
  0x32   : > { %592 = vperm.xlu1 %2159, %v553_v41   ;;  %589 = vperm.xlu0 %2158, %v552_v42  }
  0x36   : > { %598 = vperm.xlu1 %2159, %v555_v45   ;;  %595 = vperm.xlu0 %2158, %v554_v46   ;;  %v2605_v45 = vld [vmem:[#allocation2 + $0x28] sm:$0xff]  ;;  %v2607_v46 = vld [vmem:[#allocation2 + $0x20] sm:$0xff] }
  0x37   : > { %3698 = vst [vmem:[#allocation13_spill] sm:$0xff] %v2605_v45  ;;  %3699 = vst [vmem:[#allocation14_spill] sm:$0xff] %v2607_v46 }
  0x3a   : > { %604 = vperm.xlu1 %2159, %v557_v47   ;;  %601 = vperm.xlu0 %2158, %v556_v48  }
  0x3e   : > { %1216 = vperm.xlu1 %2159, %v511_v20   ;;  %1211 = vperm.xlu0 %2158, %v2464_v17   ;;  %v2555_v20 = vrot.slane %v716_v54, %v865_v5 }
  0x42   : > { %1226 = vperm.xlu1 %2159, %v2469_v18   ;;  %1221 = vperm.xlu0 %2158, %v2459_v16   ;;  %v2551_v18 = vrot.slane %v716_v54, %v829_v4 }
  0x46   : > { %1236 = vperm.xlu1 %2159, %v515_v23   ;;  %1231 = vperm.xlu0 %2158, %v514_v24  }
  0x4a   : > { %1246 = vperm.xlu1 %2159, %v517_v27   ;;  %1241 = vperm.xlu0 %2158, %v516_v28   ;;  %v2570_v27 = vadd.f32 %v797_v14, %v778_v13  ;;  %v2572_v28 = vrot.slane %v716_v54, %v901_v15 }
  0x4e   : > { %1256 = vperm.xlu1 %2159, %v519_v31   ;;  %1251 = vperm.xlu0 %2158, %v518_v32  }
  0x52   : > { %1266 = vperm.xlu1 %2159, %v521_v35   ;;  %1261 = vperm.xlu0 %2158, %v520_v36   ;;  %v2585_v35 = vmul.f32 0.0, %v2566_v25 }
  0x54   : > { %3696 = vst [vmem:[#allocation11_spill] sm:$0xff] %v2585_v35 }
  0x56   : > { %1276 = vperm.xlu1 %2159, %v523_v39   ;;  %1271 = vperm.xlu0 %2158, %v522_v40   ;;  %v2594_v40 = vmul.f32 0.0, %v2579_v33 }
  0x58   : > { %3697 = vst [vmem:[#allocation12_spill] sm:$0xff] %v2594_v40 }
  0x5a   : > { %1286 = vperm.xlu1 %2159, %v525_v43   ;;  %1281 = vperm.xlu0 %2158, %v524_v44  }
  0x9d   : > { %v566_v63 = vpop.permute.xlu1 %565  ;;  %v560_v3 = vpop.permute.xlu0 %559 }
  0x9e   : > { %vm606_vm1 = vcmp.eq.s32.totalorder %v560_v3, 1  ;;  %vm608_vm3 = vcmp.eq.s32.totalorder %v566_v63, 1 }
  0x9f   : > { %v2541_v6 = vsel %vm606_vm1, 0.0, %v2533_v62  ;;  %v2563_v23 = vsel %vm608_vm3, 0.0, %v2548_v12 }
  0xa0   : > { %3691 = vst [vmem:[#allocation6_spill] sm:$0xff] %v2541_v6  ;;  %v640_v9 = vrot.slane %v2541_v6, 7  ;;  %v678_v24 = vrot.slane %v2541_v6, 1  ;;  %v642_v36 = vrot.slane %v2563_v23, 7  ;;  %v2590_v37 = vmul.f32 %v2521_v57, %v2563_v23 }
  0xa1   : > { %v569_v16 = vpop.permute.xlu1 %568  ;;  %v563_v17 = vpop.permute.xlu0 %562  ;;  %v2598_v41 = vmul.f32 %v2555_v20, %v2563_v23  ;;  %v764_v43 = vmul.f32 %v2521_v57, %v2541_v6  ;;  %v867_v48 = vmul.f32 %v2555_v20, %v2541_v6 }
  0xa2   : > { %v662_v19 = vsel %vm657_vm2, %v640_v9, 0.0  ;;  %vm609_vm4 = vcmp.eq.s32.totalorder %v569_v16, 1  ;;  %v700_v42 = vsel %vm696_vm5, %v678_v24, 0.0  ;;  %vm607_vm6 = vcmp.eq.s32.totalorder %v563_v17, 1 }
  0xa3   : > { %v2560_v22 = vsel %vm609_vm4, 0.0, %v2546_v11  ;;  %v730_v29 = vmul.f32 %v2519_v56, %v662_v19  ;;  %v831_v30 = vmul.f32 %v2551_v18, %v662_v19  ;;  %v798_v52 = vmul.f32 %v2537_v2, %v700_v42  ;;  %v2732_v11 = vld [vmem:[#allocation2 + $0x48] sm:$0xff] }
  0xa4   : > { %3694 = vst [vmem:[#allocation9_spill] sm:$0xff] %v2560_v22  ;;  %v643_v26 = vrot.slane %v2560_v22, 7  ;;  %v681_v44 = vrot.slane %v2560_v22, 1  ;;  %v2626_v58 = vsel %vm657_vm2, %v642_v36, 0.0  ;;  %v2629_v59 = vmul.f32 %v2572_v28, %v700_v42  ;;  %3712 = vst [vmem:[#allocation27_spill] sm:$0xff] %v2732_v11 }
  0xa5   : > { %v575_v32 = vpop.permute.xlu1 %574  ;;  %v572_v39 = vpop.permute.xlu0 %571  ;;  %v745_v47 = vadd.f32 %v2529_v60, %v730_v29  ;;  %v847_v50 = vadd.f32 %v831_v30, %v2570_v27  ;;  %v767_v0 = vmul.f32 %v2521_v57, %v2560_v22  ;;  %v2640_v5 = vmul.f32 %v2555_v20, %v2560_v22  ;;  %v2664_v29 = vld [vmem:[#allocation2 + $0x38] sm:$0xff] }
  0xa6   : > { %v665_v31 = vsel %vm657_vm2, %v643_v26, 0.0  ;;  %vm611_vm7 = vcmp.eq.s32.totalorder %v575_v32, 1  ;;  %vm610_vm8 = vcmp.eq.s32.totalorder %v572_v39, 1  ;;  %v2633_v63 = vsel %vm696_vm5, %v681_v44, 0.0  ;;  %3705 = vst [vmem:[#allocation20_spill] sm:$0xff] %v2664_v29 }
  0xa7   : > { %v733_v38 = vmul.f32 %v2519_v56, %v665_v31  ;;  %v2619_v54 = vsel %vm611_vm7, 0.0, %v2605_v45  ;;  %v2622_v55 = vsel %vm610_vm8, 0.0, %v2607_v46  ;;  %v779_v4 = vadd.f32 %v764_v43, %v745_v47  ;;  %v2677_v43 = vld [vmem:[#allocation2 + $0x30] sm:$0xff] }
  0xa8   : > { %3701 = vst [vmem:[#allocation16_spill] sm:$0xff] %v2619_v54  ;;  %3702 = vst [vmem:[#allocation17_spill] sm:$0xff] %v2622_v55  ;;  %v645_v1 = vrot.slane %v2619_v54, 7  ;;  %v2644_v7 = vmul.f32 %v2566_v25, %v2560_v22  ;;  %v644_v9 = vrot.slane %v2622_v55, 7  ;;  %v2647_v10 = vadd.f32 %v867_v48, %v847_v50 }
  0xa9   : > { %v748_v51 = vadd.f32 %v2529_v60, %v733_v38  ;;  %v581_v3 = vpop.permute.xlu1 %580  ;;  %v2651_v14 = vsel %vm607_vm6, 0.0, %v2616_v53  ;;  %v578_v16 = vpop.permute.xlu0 %577  ;;  %v801_v19 = vmul.f32 %v2537_v2, %v2633_v63  ;;  %v2658_v24 = vmul.f32 %v2551_v18, %v665_v31  ;;  %3707 = vst [vmem:[#allocation22_spill] sm:$0xff] %v2677_v43 }
  0xaa   : > { %3703 = vst [vmem:[#allocation18_spill] sm:$0xff] %v2644_v7  ;;  %v667_v15 = vsel %vm657_vm2, %v645_v1, 0.0  ;;  %v2662_v26 = vmul.f32 %v2572_v28, %v2633_v63  ;;  %vm613_vm9 = vcmp.eq.s32.totalorder %v581_v3, 1  ;;  %v2667_v17 = vmul.f32 %v2557_v21, %v665_v31 }
  0xab   : > { %v782_v13 = vadd.f32 %v767_v0, %v748_v51  ;;  %v683_v30 = vrot.slane %v2619_v54, 1  ;;  %v735_v32 = vmul.f32 %v2519_v56, %v667_v15  ;;  %v666_v36 = vsel %vm657_vm2, %v644_v9, 0.0 }
  0xac   : > { %3704 = vst [vmem:[#allocation19_spill] sm:$0xff] %v2662_v26  ;;  %3706 = vst [vmem:[#allocation21_spill] sm:$0xff] %v2667_v17  ;;  %v2673_v38 = vadd.f32 %v798_v52, %v779_v4  ;;  %v734_v42 = vmul.f32 %v2519_v56, %v666_v36  ;;  %vm612_vm10 = vcmp.eq.s32.totalorder %v578_v16, 1  ;;  %v2681_v31 = vmul.f32 %v2521_v57, %v2651_v14 }
  0xad   : > { %v816_v44 = vadd.f32 %v801_v19, %v782_v13  ;;  %v682_v47 = vrot.slane %v2622_v55, 1  ;;  %v2685_v48 = vsel %vm613_vm9, 0.0, %v2664_v29  ;;  %v2689_v50 = vmul.f32 %v2555_v20, %v2651_v14  ;;  %v587_v39 = vpop.permute.xlu1 %586  ;;  %v584_v62 = vpop.permute.xlu0 %583 }
  0xae   : > { %3708 = vst [vmem:[#allocation23_spill] sm:$0xff] %v2685_v48  ;;  %v769_v51 = vmul.f32 %v2521_v57, %v2619_v54  ;;  %v2695_v52 = vmul.f32 %v2555_v20, %v2619_v54  ;;  %v2699_v0 = vmul.f32 %v2566_v25, %v2619_v54  ;;  %v2703_v1 = vsel %vm696_vm5, %v683_v30, 0.0 }
  0xaf   : > { %3710 = vst [vmem:[#allocation25_spill] sm:$0xff] %v2703_v1  ;;  %v750_v3 = vadd.f32 %v2529_v60, %v735_v32  ;;  %v835_v4 = vmul.f32 %v2551_v18, %v666_v36  ;;  %v2708_v9 = vsel %vm612_vm10, 0.0, %v2677_v43  ;;  %v749_v13 = vadd.f32 %v2529_v60, %v734_v42 }
  0xb0   : > { %3709 = vst [vmem:[#allocation24_spill] sm:$0xff] %v2699_v0  ;;  %3711 = vst [vmem:[#allocation26_spill] sm:$0xff] %v2708_v9  ;;  %v768_v16 = vmul.f32 %v2521_v57, %v2622_v55  ;;  %v871_v19 = vmul.f32 %v2555_v20, %v2622_v55  ;;  %v647_v49 = vrot.slane %v2685_v48, 7  ;;  %v2718_v30 = vsel %vm696_vm5, %v682_v47, 0.0 }
  0xb1   : > { %v851_v32 = vadd.f32 %v835_v4, %v816_v44  ;;  %v685_v29 = vrot.slane %v2685_v48, 1  ;;  %v646_v45 = vrot.slane %v2708_v9, 7  ;;  %v803_v42 = vmul.f32 %v2537_v2, %v2703_v1 }
  0xb2   : > { %v836_v43 = vmul.f32 %v2551_v18, %v667_v15  ;;  %v2727_v54 = vmul.f32 %v2572_v28, %v2703_v1  ;;  %v2730_v46 = vmul.f32 %v2557_v21, %v667_v15  ;;  %v784_v47 = vadd.f32 %v769_v51, %v750_v3 }
  0xb3   : > { %v2736_v44 = vmul.f32 %v2566_v25, %v2622_v55  ;;  %v668_v4 = vsel %vm657_vm2, %v646_v45, 0.0  ;;  %vm615_vm11 = vcmp.eq.s32.totalorder %v587_v39, 1  ;;  %v783_v12 = vadd.f32 %v768_v16, %v749_v13 }
  0xb4   : > { %v802_v53 = vmul.f32 %v2537_v2, %v2718_v30  ;;  %v669_v22 = vsel %vm657_vm2, %v647_v49, 0.0  ;;  %v736_v15 = vmul.f32 %v2519_v56, %v668_v4  ;;  %v887_v6 = vadd.f32 %v871_v19, %v851_v32 }
  0xb5   : > { %3713 = vst [vmem:[#allocation28_spill] sm:$0xff] %v2736_v44  ;;  %v907_v51 = vmul.f32 %v2572_v28, %v2718_v30  ;;  %v707_v3 = vsel %vm696_vm5, %v685_v29, 0.0  ;;  %v2750_v45 = vsel %vm615_vm11, 0.0, %v2732_v11  ;;  %v2753_v39 = vmul.f32 %v2557_v21, %v666_v36  ;;  %v2766_v11 = vld [vmem:[#allocation2 + $0x40] sm:$0xff] }
  0xb6   : > { %3714 = vst [vmem:[#allocation29_spill] sm:$0xff] %v2750_v45  ;;  %v2757_v13 = vmul.f32 %v2555_v20, %v2685_v48  ;;  %v684_v49 = vrot.slane %v2708_v9, 1  ;;  %v649_v16 = vrot.slane %v2750_v45, 7  ;;  %v818_v19 = vadd.f32 %v803_v42, %v784_v47  ;;  %3717 = vst [vmem:[#allocation32_spill] sm:$0xff] %v2766_v11 }
  0xb7   : > { %3715 = vst [vmem:[#allocation30_spill] sm:$0xff] %v2753_v39  ;;  %v838_v32 = vmul.f32 %v2551_v18, %v669_v22  ;;  %v2764_v29 = vmul.f32 %v2566_v25, %v2685_v48  ;;  %vm614_vm12 = vcmp.eq.s32.totalorder %v584_v62, 1  ;;  %v817_v36 = vadd.f32 %v802_v53, %v783_v12  ;;  %v593_v12 = vpop.permute.xlu1 %592 }
  0xb8   : > { %v2769_v55 = vmul.f32 %v2572_v28, %v707_v3  ;;  %v751_v40 = vadd.f32 %v2529_v60, %v736_v15  ;;  %v671_v35 = vsel %vm657_vm2, %v649_v16, 0.0  ;;  %v2774_v44 = vadd.f32 %v907_v51, %v887_v6 }
  0xb9   : > { %3716 = vst [vmem:[#allocation31_spill] sm:$0xff] %v2764_v29  ;;  %v2777_v42 = vmul.f32 %v2557_v21, %v669_v22  ;;  %v2780_v47 = vmul.f32 %v2579_v33, %v707_v3  ;;  %v770_v62 = vmul.f32 %v2521_v57, %v2708_v9  ;;  %v2786_v53 = vsel %vm696_vm5, %v684_v49, 0.0  ;;  %v2793_v22 = vld [vmem:[#allocation2 + $0x58] sm:$0xff] }
  0xba   : > { %3718 = vst [vmem:[#allocation33_spill] sm:$0xff] %v2769_v55  ;;  %3721 = vst [vmem:[#allocation36_spill] sm:$0xff] %v2786_v53  ;;  %v837_v15 = vmul.f32 %v2551_v18, %v668_v4  ;;  %v687_v16 = vrot.slane %v2750_v45, 1  ;;  %v2791_v6 = vsel %vm614_vm12, 0.0, %v2766_v11  ;;  %v873_v51 = vmul.f32 %v2555_v20, %v2708_v9 }
  0xbb   : > { %3719 = vst [vmem:[#allocation34_spill] sm:$0xff] %v2777_v42  ;;  %3720 = vst [vmem:[#allocation35_spill] sm:$0xff] %v2780_v47  ;;  %v2799_v3 = vmul.f32 %v2566_v25, %v2708_v9  ;;  %v738_v48 = vmul.f32 %v2519_v56, %v671_v35  ;;  %v648_v49 = vrot.slane %v2791_v6, 7  ;;  %v590_v47 = vpop.permute.xlu0 %589  ;;  %v2803_v29 = vadd.f32 %v836_v43, %v817_v36 }
  0xbc   : > { %3722 = vst [vmem:[#allocation37_spill] sm:$0xff] %v2791_v6  ;;  %3723 = vst [vmem:[#allocation38_spill] sm:$0xff] %v2793_v22  ;;  %v785_v42 = vadd.f32 %v770_v62, %v751_v40  ;;  %v853_v7 = vadd.f32 %v837_v15, %v818_v19  ;;  %vm617_vm13 = vcmp.eq.s32.totalorder %v593_v12, 1  ;;  %v804_v11 = vmul.f32 %v2537_v2, %v2786_v53  ;;  %v2822_v19 = vld [vmem:[#allocation2 + $0x50] sm:$0xff] }
  0xbd   : > { %3724 = vst [vmem:[#allocation39_spill] sm:$0xff] %v2799_v3  ;;  %v909_v34 = vmul.f32 %v2572_v28, %v2786_v53  ;;  %v670_v9 = vsel %vm657_vm2, %v648_v49, 0.0  ;;  %v2812_v3 = vsel %vm617_vm13, 0.0, %v2793_v22  ;;  %v2815_v39 = vmul.f32 %v2557_v21, %v668_v4  ;;  %3728 = vst [vmem:[#allocation43_spill] sm:$0xff] %v2822_v19 }
  0xbe   : > { %3725 = vst [vmem:[#allocation40_spill] sm:$0xff] %v2812_v3  ;;  %v2819_v40 = vsel %vm696_vm5, %v687_v16, 0.0  ;;  %v737_v43 = vmul.f32 %v2519_v56, %v670_v9  ;;  %vm616_vm14 = vcmp.eq.s32.totalorder %v590_v47, 1  ;;  %v753_v36 = vadd.f32 %v2529_v60, %v738_v48 }
  0xbf   : > { %3726 = vst [vmem:[#allocation41_spill] sm:$0xff] %v2815_v39  ;;  %3727 = vst [vmem:[#allocation42_spill] sm:$0xff] %v2819_v40  ;;  %v772_v62 = vmul.f32 %v2521_v57, %v2750_v45  ;;  %v686_v12 = vrot.slane %v2791_v6, 1  ;;  %v651_v15 = vrot.slane %v2812_v3, 7  ;;  %v819_v4 = vadd.f32 %v804_v11, %v785_v42 }
  0xc0   : > { %v889_v49 = vadd.f32 %v873_v51, %v853_v7  ;;  %v2831_v16 = vmul.f32 %v2555_v20, %v2750_v45  ;;  %v752_v22 = vadd.f32 %v2529_v60, %v737_v43  ;;  %v806_v47 = vmul.f32 %v2537_v2, %v2819_v40  ;;  %v599_v43 = vpop.permute.xlu1 %598 }
  0xc1   : > { %v840_v48 = vmul.f32 %v2551_v18, %v671_v35  ;;  %v2839_v53 = vmul.f32 %v2566_v25, %v2750_v45  ;;  %v2842_v17 = vsel %vm616_vm14, 0.0, %v2822_v19  ;;  %v2846_v11 = vmul.f32 %v2572_v28, %v2819_v40 }
  0xc2   : > { %3730 = vst [vmem:[#allocation45_spill] sm:$0xff] %v2842_v17  ;;  %v771_v7 = vmul.f32 %v2521_v57, %v2791_v6  ;;  %v839_v42 = vmul.f32 %v2551_v18, %v670_v9  ;;  %v673_v51 = vsel %vm657_vm2, %v651_v15, 0.0  ;;  %v787_v55 = vadd.f32 %v772_v62, %v753_v36 }
  0xc3   : > { %3729 = vst [vmem:[#allocation44_spill] sm:$0xff] %v2839_v53  ;;  %3731 = vst [vmem:[#allocation46_spill] sm:$0xff] %v2846_v11  ;;  %v708_v45 = vsel %vm696_vm5, %v686_v12, 0.0  ;;  %v689_v19 = vrot.slane %v2812_v3, 1  ;;  %v650_v53 = vrot.slane %v2842_v17, 7  ;;  %v2857_v0 = vadd.f32 %v838_v32, %v819_v4  ;;  %v2869_v12 = vld [vmem:[#allocation2 + $0x68] sm:$0xff] }
  0xc4   : > { %v2859_v40 = vadd.f32 %v909_v34, %v889_v49  ;;  %v2862_v11 = vmul.f32 %v2557_v21, %v671_v35  ;;  %v786_v9 = vadd.f32 %v771_v7, %v752_v22  ;;  %v875_v15 = vmul.f32 %v2555_v20, %v2791_v6  ;;  %3734 = vst [vmem:[#allocation49_spill] sm:$0xff] %v2869_v12  ;;  %v605_v1 = vpop.permute.xlu1 %604 }
  0xc5   : > { %v740_v36 = vmul.f32 %v2519_v56, %v673_v51  ;;  %v672_v62 = vsel %vm657_vm2, %v650_v53, 0.0  ;;  %vm619_vm15 = vcmp.eq.s32.totalorder %v599_v43, 1  ;;  %v805_v32 = vmul.f32 %v2537_v2, %v708_v45  ;;  %v596_v43 = vpop.permute.xlu0 %595 }
  0xc6   : > { %3732 = vst [vmem:[#allocation47_spill] sm:$0xff] %v2859_v40  ;;  %3733 = vst [vmem:[#allocation48_spill] sm:$0xff] %v2862_v11  ;;  %v855_v34 = vadd.f32 %v839_v42, %v2570_v27  ;;  %v911_v4 = vmul.f32 %v2572_v28, %v708_v45  ;;  %v739_v35 = vmul.f32 %v2519_v56, %v672_v62  ;;  %v2877_v49 = vsel %vm696_vm5, %v689_v19, 0.0  ;;  %v2893_v19 = vld [vmem:[#allocation2 + $0x60] sm:$0xff] }
  0xc7   : > { %v821_v22 = vadd.f32 %v806_v47, %v787_v55  ;;  %3735 = vst [vmem:[#allocation50_spill] sm:$0xff] %v2877_v49  ;;  %v774_v7 = vmul.f32 %v2521_v57, %v2812_v3  ;;  %v2883_v53 = vmul.f32 %v2555_v20, %v2812_v3  ;;  %v820_v6 = vadd.f32 %v805_v32, %v786_v9 }
  0xc8   : > { %v2887_v27 = vmul.f32 %v2566_v25, %v2812_v3  ;;  %v688_v45 = vrot.slane %v2842_v17, 1  ;;  %v2891_v55 = vsel %vm619_vm15, 0.0, %v2869_v12  ;;  %3739 = vst [vmem:[#allocation54_spill] sm:$0xff] %v2893_v19  ;;  %v755_v47 = vadd.f32 %v2529_v60, %v740_v36 }
  0xc9   : > { %3736 = vst [vmem:[#allocation51_spill] sm:$0xff] %v2883_v53  ;;  %3738 = vst [vmem:[#allocation53_spill] sm:$0xff] %v2891_v55  ;;  %v754_v42 = vadd.f32 %v2529_v60, %v739_v35  ;;  %v841_v11 = vmul.f32 %v2551_v18, %v672_v62  ;;  %v653_v53 = vrot.slane %v2891_v55, 7  ;;  %v891_v9 = vadd.f32 %v875_v15, %v855_v34 }
  0xca   : > { %3737 = vst [vmem:[#allocation52_spill] sm:$0xff] %v2887_v27  ;;  %v808_v32 = vmul.f32 %v2537_v2, %v2877_v49  ;;  %v773_v3 = vmul.f32 %v2521_v57, %v2842_v17  ;;  %vm618_vm0 = vcmp.eq.s32.totalorder %v596_v43, 1  ;;  %v691_v36 = vrot.slane %v2891_v55, 1 }
  0xcb   : > { %v857_v12 = vadd.f32 %v841_v11, %v821_v22  ;;  %v675_v27 = vsel %vm657_vm2, %v653_v53, 0.0  ;;  %v2907_v35 = vsel %vm618_vm0, 0.0, %v2893_v19  ;;  %v856_v40 = vadd.f32 %v840_v48, %v820_v6  ;;  %v2946_v19 = vld [vmem:[#allocation2 + $0x78] sm:$0xff] }
  0xcc   : > { %3740 = vst [vmem:[#allocation55_spill] sm:$0xff] %v2907_v35  ;;  %v842_v39 = vmul.f32 %v2551_v18, %v673_v51  ;;  %v2912_v15 = vsel %vm696_vm5, %v688_v45, 0.0  ;;  %v877_v34 = vmul.f32 %v2555_v20, %v2842_v17  ;;  %v789_v43 = vadd.f32 %v774_v7, %v755_v47  ;;  %3745 = vst [vmem:[#allocation60_spill] sm:$0xff] %v2946_v19 }
  0xcd   : > { %3741 = vst [vmem:[#allocation56_spill] sm:$0xff] %v2912_v15  ;;  %v788_v11 = vadd.f32 %v773_v3, %v754_v42  ;;  %v742_v22 = vmul.f32 %v2519_v56, %v675_v27  ;;  %v652_v53 = vrot.slane %v2907_v35, 7  ;;  %v2918_v26 = vadd.f32 %v911_v4, %v891_v9 }
  0xce   : > { %v2922_v6 = vmul.f32 %v2572_v28, %v2877_v49  ;;  %v2925_v48 = vmul.f32 %v2557_v21, %v673_v51  ;;  %v2929_v45 = vmul.f32 %v2566_v25, %v2842_v17  ;;  %v807_v3 = vmul.f32 %v2537_v2, %v2912_v15  ;;  %v602_v17 = vpop.permute.xlu0 %601 }
  0xcf   : > { %v893_v7 = vadd.f32 %v877_v34, %v857_v12  ;;  %v913_v47 = vmul.f32 %v2572_v28, %v2912_v15  ;;  %v2937_v4 = vsel %vm696_vm5, %v691_v36, 0.0  ;;  %v2940_v42 = vadd.f32 %v2831_v16, %v856_v40 }
  0xd0   : > { %3742 = vst [vmem:[#allocation57_spill] sm:$0xff] %v2922_v6  ;;  %3743 = vst [vmem:[#allocation58_spill] sm:$0xff] %v2925_v48  ;;  %v2943_v51 = vmul.f32 %v2557_v21, %v672_v62  ;;  %v690_v9 = vrot.slane %v2907_v35, 1  ;;  %vm621_vm1 = vcmp.eq.s32.totalorder %v605_v1, 1  ;;  %v823_v12 = vadd.f32 %v808_v32, %v789_v43  ;;  %v2951_v48 = vld [vmem:[#allocation2 + $0x70] sm:$0xff] }
  0xd1   : > { %3744 = vst [vmem:[#allocation59_spill] sm:$0xff] %v2937_v4  ;;  %v822_v34 = vadd.f32 %v807_v3, %v788_v11  ;;  %v757_v49 = vadd.f32 %v2529_v60, %v742_v22  ;;  %v674_v36 = vsel %vm657_vm2, %v652_v53, 0.0  ;;  %3746 = vst [vmem:[#allocation61_spill] sm:$0xff] %v2951_v48  ;;  %v776_v40 = vmul.f32 %v2521_v57, %v2891_v55 }
  0xd2   : > { %v810_v16 = vmul.f32 %v2537_v2, %v2937_v4  ;;  %v2958_v62 = vmul.f32 %v2551_v18, %v675_v27  ;;  %v2962_v1 = vmul.f32 %v2555_v20, %v2891_v55  ;;  %v2964_v32 = vadd.f32 %v913_v47, %v893_v7 }
  0xd3   : > { %v2968_v43 = vmul.f32 %v2572_v28, %v2937_v4  ;;  %v2971_v11 = vsel %vm621_vm1, 0.0, %v2946_v19  ;;  %vm620_vm3 = vcmp.eq.s32.totalorder %v602_v17, 1  ;;  %v2974_v22 = vmul.f32 %v2557_v21, %v675_v27 }
  0xd4   : > { %3747 = vst [vmem:[#allocation62_spill] sm:$0xff] %v2962_v1  ;;  %3748 = vst [vmem:[#allocation63_spill] sm:$0xff] %v2964_v32  ;;  %v2978_v53 = vsel %vm696_vm5, %v690_v9, 0.0  ;;  %v741_v3 = vmul.f32 %v2519_v56, %v674_v36  ;;  %v2982_v7 = vsel %vm620_vm3, 0.0, %v2951_v48  ;;  %v2984_v47 = vadd.f32 %v842_v39, %v822_v34 }
  0xd5   : > { %3749 = vst [vmem:[#allocation64_spill] sm:$0xff] %v2968_v43  ;;  %3750 = vst [vmem:[#allocation65_spill] sm:$0xff] %v2971_v11  ;;  %v791_v4 = vadd.f32 %v776_v40, %v757_v49  ;;  %v775_v19 = vmul.f32 %v2521_v57, %v2907_v35  ;;  %v654_v17 = vrot.slane %v2982_v7, 7  ;;  %v843_v27 = vmul.f32 %v2551_v18, %v674_v36 }
  0xd6   : > { %3751 = vst [vmem:[#allocation66_spill] sm:$0xff] %v2974_v22  ;;  %3752 = vst [vmem:[#allocation67_spill] sm:$0xff] %v2978_v53  ;;  %v879_v55 = vmul.f32 %v2555_v20, %v2907_v35  ;;  %v2994_v9 = vmul.f32 %v2566_v25, %v2907_v35  ;;  %v655_v48 = vrot.slane %v2971_v11, 7  ;;  %v809_v39 = vmul.f32 %v2537_v2, %v2978_v53 }
  0xd7   : > { %3753 = vst [vmem:[#allocation68_spill] sm:$0xff] %v2982_v7  ;;  %v3001_v49 = vmul.f32 %v2572_v28, %v2978_v53  ;;  %v3005_v34 = vsel %vm657_vm2, %v654_v17, 0.0  ;;  %v692_v40 = vrot.slane %v2982_v7, 1  ;;  %v756_v22 = vadd.f32 %v2529_v60, %v741_v3 }
  0xd8   : > { %3754 = vst [vmem:[#allocation69_spill] sm:$0xff] %v2994_v9  ;;  %v859_v43 = vadd.f32 %v843_v27, %v823_v12  ;;  %v3010_v35 = vmul.f32 %v2557_v21, %v674_v36  ;;  %v743_v9 = vmul.f32 %v2519_v56, %v3005_v34  ;;  %v3014_v32 = vadd.f32 %v810_v16, %v791_v4 }
  0xd9   : > { %v693_v53 = vrot.slane %v2971_v11, 1  ;;  %v3757_v1 = vrot.slane %v2651_v14, 7  ;;  %v679_v6 = vrot.slane %v2651_v14, 1  ;;  %v3024_v12 = vsel %vm657_vm2, %v655_v48, 0.0 }
  0xda   : > { %3755 = vst [vmem:[#allocation70_spill] sm:$0xff] %v3010_v35  ;;  %3756 = vst [vmem:[#allocation71_spill] sm:$0xff] %v3014_v32  ;;  %v3028_v36 = vsel %vm696_vm5, %v692_v40, 0.0  ;;  %v758_v4 = vadd.f32 %v2529_v60, %v743_v9  ;;  %v777_v16 = vmul.f32 %v2521_v57, %v2982_v7  ;;  %v732_v48 = vmul.f32 %v2519_v56, %v2626_v58 }
  0xdb   : > { %v663_v17 = vsel %vm657_vm2, %v3757_v1, 0.0  ;;  %v701_v3 = vsel %vm696_vm5, %v679_v6, 0.0  ;;  %v3758_v1 = vrot.slane %v2563_v23, 1  ;;  %v790_v40 = vadd.f32 %v775_v19, %v756_v22 }
  0xdc   : > { %v731_v61 = vmul.f32 %v2519_v56, %v663_v17  ;;  %v3042_v35 = vadd.f32 %v879_v55, %v859_v43  ;;  %v3046_v9 = vmul.f32 %v2555_v20, %v2971_v11  ;;  %v792_v57 = vadd.f32 %v777_v16, %v758_v4 }
  0xdd   : > { %v702_v27 = vsel %vm696_vm5, %v3758_v1, 0.0  ;;  %v747_v7 = vadd.f32 %v2529_v60, %v732_v48  ;;  %v832_v1 = vmul.f32 %v2551_v18, %v663_v17  ;;  %v3054_v32 = vsel %vm696_vm5, %v693_v53, 0.0 }
  0xde   : > { %v746_v6 = vadd.f32 %v2529_v60, %v731_v61  ;;  %v800_v15 = vmul.f32 %v2537_v2, %v702_v27  ;;  %v3058_v56 = vmul.f32 %v2551_v18, %v3024_v12  ;;  %v811_v55 = vmul.f32 %v2537_v2, %v3028_v36 }
  0xdf   : > { %v799_v19 = vmul.f32 %v2537_v2, %v701_v3  ;;  %v781_v60 = vadd.f32 %v2590_v37, %v747_v7  ;;  %v848_v22 = vadd.f32 %v832_v1, %v2673_v38  ;;  %v919_v8 = vadd.f32 %v2629_v59, %v2647_v10 }
  0xe0   : > { %v780_v43 = vadd.f32 %v2681_v31, %v746_v6  ;;  %v824_v53 = vadd.f32 %v809_v39, %v790_v40  ;;  %v826_v4 = vadd.f32 %v811_v55, %v792_v57  ;;  %v833_v16 = vmul.f32 %v2551_v18, %v2626_v58 }
  0xe1   : > { %v939_v61 = vmul.f32 %v2557_v21, %v663_v17  ;;  %v815_v11 = vadd.f32 %v800_v15, %v781_v60  ;;  %v884_v2 = vadd.f32 %v2689_v50, %v848_v22  ;;  %v904_v31 = vmul.f32 %v2572_v28, %v701_v3  ;;  %v3762_v22 = vld [vmem:[#allocation24_spill] sm:$0xff] }
  0xe2   : > { %v814_v48 = vadd.f32 %v799_v19, %v780_v43  ;;  %v905_v37 = vmul.f32 %v2572_v28, %v702_v27  ;;  %v940_v38 = vmul.f32 %v2557_v21, %v2626_v58  ;;  %v974_v59 = vmul.f32 %v2566_v25, %v2651_v14  ;;  %v3761_v43 = vld [vmem:[#allocation41_spill] sm:$0xff] }
  0xe3   : > { %v954_v7 = vadd.f32 %v939_v61, %v919_v8  ;;  %vm1064_vm2 = vcmask 261120   ;;  %v850_v39 = vadd.f32 %v2658_v24, %v815_v11  ;;  %v920_v17 = vadd.f32 %v904_v31, %v884_v2  ;;  %v3765_v2 = vld [vmem:[#allocation21_spill] sm:$0xff] }
  0xe4   : > { %v849_v10 = vadd.f32 %v833_v16, %v814_v48  ;;  %v975_v15 = vmul.f32 %v2566_v25, %v2563_v23  ;;  %v1009_v50 = vmul.f32 %v2579_v33, %v701_v3  ;;  %v1010_v40 = vmul.f32 %v2579_v33, %v702_v27 }
  0xe5   : > { %v888_v57 = vadd.f32 %v2695_v52, %v2803_v29  ;;  %v958_v58 = vadd.f32 %v2730_v46, %v2774_v44  ;;  %v886_v1 = vadd.f32 %v2640_v5, %v850_v39  ;;  %v955_v55 = vadd.f32 %v940_v38, %v920_v17  ;;  %v3759_v46 = vld [vmem:[#allocation19_spill] sm:$0xff] }
  0xe6   : > { %v885_v6 = vadd.f32 %v2598_v41, %v849_v10  ;;  %v989_v24 = vadd.f32 %v974_v59, %v954_v7  ;;  %v1011_v11 = vmul.f32 %v2579_v33, %v2633_v63  ;;  %v1012_v3 = vmul.f32 %v2579_v33, %v2718_v30  ;;  %v3760_v41 = vld [vmem:[#allocation25_spill] sm:$0xff]  ;;  %v3764_v30 = vld [vmem:[#allocation46_spill] sm:$0xff]  ;;  %v3768_v7 = vld [vmem:[#allocation36_spill] sm:$0xff] }
  0xe7   : > { %v924_v27 = vadd.f32 %v2727_v54, %v888_v57  ;;  %v890_v52 = vadd.f32 %v2757_v13, %v2857_v0  ;;  %v990_v19 = vadd.f32 %v975_v15, %v955_v55  ;;  %v922_v44 = vadd.f32 %v3759_v46, %v886_v1  ;;  %v3763_v63 = vld [vmem:[#allocation33_spill] sm:$0xff]  ;;  %v3766_v13 = vld [vmem:[#allocation30_spill] sm:$0xff] }
  0xe8   : > { %v921_v29 = vadd.f32 %v905_v37, %v885_v6  ;;  %v1013_v5 = vmul.f32 %v2579_v33, %v3760_v41  ;;  %v993_v8 = vadd.f32 %v3762_v22, %v958_v58  ;;  %v928_v61 = vadd.f32 %v3764_v30, %v2940_v42  ;;  %v3767_v37 = vld [vmem:[#allocation39_spill] sm:$0xff]  ;;  %v3769_v10 = vld [vmem:[#allocation10_spill] sm:$0xff]  ;;  %v3771_v6 = vld [vmem:[#allocation28_spill] sm:$0xff] }
  0xe9   : > { %v959_v60 = vadd.f32 %v3761_v43, %v924_v27  ;;  %v926_v16 = vadd.f32 %v3763_v63, %v890_v52  ;;  %v1024_v54 = vadd.f32 %v1009_v50, %v989_v24  ;;  %v1025_v48 = vadd.f32 %v1010_v40, %v990_v19  ;;  %v3770_v57 = vld [vmem:[#allocation18_spill] sm:$0xff]  ;;  %v3772_v50 = vld [vmem:[#allocation47_spill] sm:$0xff]  ;;  %v3774_v52 = vld [vmem:[#allocation48_spill] sm:$0xff] }
  0xea   : > { %v956_v0 = vadd.f32 %v3765_v2, %v921_v29  ;;  %v957_v31 = vadd.f32 %v3766_v13, %v922_v44  ;;  %v1014_v59 = vmul.f32 %v2579_v33, %v3768_v7  ;;  %v963_v17 = vadd.f32 %v2943_v51, %v928_v61  ;;  %v3773_v40 = vld [vmem:[#allocation34_spill] sm:$0xff]  ;;  %v3775_v44 = vld [vmem:[#allocation11_spill] sm:$0xff] }
  0xeb   : > { %v994_v38 = vadd.f32 %v3767_v37, %v959_v60  ;;  %v961_v39 = vadd.f32 %v3769_v10, %v926_v16  ;;  %v1040_v15 = vpack.c.bf16 %v1025_v48, %v1024_v54  ;;  %v960_v1 = vadd.f32 %v3773_v40, %v3772_v50  ;;  %v3778_v63 = vld [vmem:[#allocation31_spill] sm:$0xff]  ;;  %v3782_v54 = vld [vmem:[#allocation68_spill] sm:$0xff]  ;;  %v3784_v2 = vld [vmem:[#allocation62_spill] sm:$0xff] }
  0xec   : > { %v991_v58 = vadd.f32 %v3770_v57, %v956_v0  ;;  %v992_v42 = vadd.f32 %v3771_v6, %v957_v31  ;;  %v860_v55 = vadd.f32 %v2958_v62, %v824_v53  ;;  %v1028_v24 = vadd.f32 %v1013_v5, %v993_v8  ;;  %v3776_v62 = vld [vmem:[#allocation51_spill] sm:$0xff]  ;;  %v3785_v13 = vld [vmem:[#allocation42_spill] sm:$0xff] }
  0xed   : > { %v1029_v27 = vadd.f32 %v1014_v59, %v994_v38  ;;  %v962_v29 = vadd.f32 %v3774_v52, %v2918_v26  ;;  %v845_v19 = vmul.f32 %v2551_v18, %v3005_v34  ;;  %2104 = vmatprep.mubr.msk.bf16.mxu0 %vm1064_vm2, %v1040_v15  ;;  %v996_v41 = vadd.f32 %v3775_v44, %v961_v39  ;;  %v3777_v5 = vld [vmem:[#allocation71_spill] sm:$0xff]  ;;  %v3786_v38 = vld [vmem:[#allocation70_spill] sm:$0xff] }
  0xee   : > { %v1026_v51 = vadd.f32 %v1011_v11, %v991_v58  ;;  %v1027_v46 = vadd.f32 %v1012_v3, %v992_v42  ;;  %v862_v43 = vadd.f32 %v3058_v56, %v826_v4  ;;  %v998_v22 = vadd.f32 %v2929_v45, %v963_v17  ;;  %v3779_v3 = vld [vmem:[#allocation44_spill] sm:$0xff]  ;;  %v3781_v45 = vld [vmem:[#allocation57_spill] sm:$0xff]  ;;  %v3787_v39 = vld [vmem:[#allocation35_spill] sm:$0xff] }
  0xef   : > { %v1042_v60 = vpack.c.bf16 %v1029_v27, %v1028_v24  ;;  %v894_v53 = vadd.f32 %v3776_v62, %v2984_v47  ;;  %v931_v26 = vadd.f32 %v3001_v49, %v3042_v35  ;;  %v861_v8 = vadd.f32 %v845_v19, %v3777_v5  ;;  %v3780_v56 = vld [vmem:[#allocation56_spill] sm:$0xff]  ;;  %v3789_v15 = vld [vmem:[#allocation58_spill] sm:$0xff]  ;;  %v3792_v27 = vld [vmem:[#allocation69_spill] sm:$0xff] }
  0xf0   : > { %v1041_v18 = vpack.c.bf16 %v1027_v46, %v1026_v51  ;;  %v995_v16 = vadd.f32 %v3778_v63, %v960_v1  ;;  %v918_v11 = vmul.f32 %v2572_v28, %v3054_v32  ;;  %v997_v30 = vadd.f32 %v3779_v3, %v962_v29  ;;  %v3783_v49 = vld [vmem:[#allocation12_spill] sm:$0xff]  ;;  %v3791_v1 = vld [vmem:[#allocation66_spill] sm:$0xff]  ;;  %v3793_v19 = vld [vmem:[#allocation53_spill] sm:$0xff] }
  0xf1   : > { %v1018_v4 = vmul.f32 %v2579_v33, %v3780_v56  ;;  %v930_v61 = vadd.f32 %v3781_v45, %v894_v53  ;;  %v881_v47 = vmul.f32 %v2555_v20, %v3782_v54  ;;  %v952_v35 = vmul.f32 %v2557_v21, %v3005_v34  ;;  %v3788_v34 = vld [vmem:[#allocation63_spill] sm:$0xff]  ;;  %v3790_v58 = vld [vmem:[#allocation64_spill] sm:$0xff]  ;;  %v3798_v45 = vld [vmem:[#allocation65_spill] sm:$0xff] }
  0xf2   : > { %2105 = vmatmul.mubr.msk.bf16.vlgmr.msra.gmra.mrb[0].mxu0 %vm1064_vm2, %v1041_v18  ;;  %v1031_v48 = vadd.f32 %v3783_v49, %v996_v41  ;;  %v896_v0 = vadd.f32 %v3784_v2, %v860_v55  ;;  %v1017_v31 = vmul.f32 %v2579_v33, %v3785_v13  ;;  %v898_v59 = vadd.f32 %v3046_v9, %v862_v43  ;;  %v3794_v43 = vld [vmem:[#allocation52_spill] sm:$0xff]  ;;  %v1217_v13 = vpop.permute.xlu1 %1216 }
  0xf3   : > { %2108 = vmatprep.mubr.msk.bf16.mxu0 %vm1064_vm2, %v1042_v60  ;;  %v1033_v37 = vadd.f32 %v1018_v4, %v998_v22  ;;  %v965_v7 = vadd.f32 %v3786_v38, %v930_v61  ;;  %v897_v20 = vadd.f32 %v881_v47, %v861_v8  ;;  %v1030_v17 = vadd.f32 %v3787_v39, %v995_v16  ;;  %v3795_v22 = vld [vmem:[#allocation67_spill] sm:$0xff]  ;;  %v3796_v8 = vld [vmem:[#allocation50_spill] sm:$0xff] }
  0xf4   : > { %v964_v57 = vadd.f32 %v3789_v15, %v3788_v34  ;;  %v932_v6 = vadd.f32 %v3790_v58, %v896_v0  ;;  %v917_v42 = vmul.f32 %v2572_v28, %v3028_v36  ;;  %v987_v50 = vmul.f32 %v2566_v25, %v3782_v54 }
  0xf5   : > { %v1032_v40 = vadd.f32 %v1017_v31, %v997_v30  ;;  %v966_v55 = vadd.f32 %v3791_v1, %v931_v26  ;;  %v1043_v24 = vpack.c.bf16 %v1031_v48, %v1030_v17  ;;  %v1000_v9 = vadd.f32 %v3792_v27, %v965_v7 }
  0xf6   : > { %v967_v52 = vadd.f32 %v952_v35, %v932_v6  ;;  %v934_v29 = vadd.f32 %v918_v11, %v898_v59  ;;  %v986_v51 = vmul.f32 %v2566_v25, %v3793_v19  ;;  %v933_v41 = vadd.f32 %v917_v42, %v897_v20  ;;  %v3797_v11 = vld [vmem:[#allocation59_spill] sm:$0xff] }
  0xf7   : > { %v1044_v46 = vpack.c.bf16 %v1033_v37, %v1032_v40  ;;  %v999_v60 = vadd.f32 %v3794_v43, %v964_v57  ;;  %v1020_v28 = vmul.f32 %v2579_v33, %v3795_v22  ;;  %v1022_v26 = vmul.f32 %v2579_v33, %v3028_v36  ;;  %v1227_v37 = vpop.permute.xlu1 %1226  ;;  %v3799_v40 = vld [vmem:[#allocation6_spill] sm:$0xff] }
  0xf8   : > { %v1002_v62 = vadd.f32 %v987_v50, %v967_v52  ;;  %v1001_v53 = vadd.f32 %v986_v51, %v966_v55  ;;  %v953_v5 = vmul.f32 %v2557_v21, %v3024_v12  ;;  %v1019_v18 = vmul.f32 %v2579_v33, %v3796_v8 }
  0xf9   : > { %v1035_v63 = vadd.f32 %v1020_v28, %v1000_v9  ;;  %v969_v16 = vadd.f32 %v3769_v10, %v934_v29  ;;  %v1021_v3 = vmul.f32 %v2579_v33, %v3797_v11  ;;  %v988_v21 = vmul.f32 %v2566_v25, %v3798_v45  ;;  %v1212_v25 = vpop.permute.xlu0 %1211  ;;  %v3800_v9 = vld [vmem:[#allocation5_spill] sm:$0xff] }
  0xfa   : > { %2109 = vmatmul.mubr.msk.bf16.gmra.mrb[4].mxu0 %vm1064_vm2, %v1043_v24  ;;  %v1037_v30 = vadd.f32 %v1022_v26, %v1002_v62  ;;  %v1034_v56 = vadd.f32 %v1019_v18, %v999_v60  ;;  %v968_v4 = vadd.f32 %v953_v5, %v933_v41  ;;  %v1023_v10 = vmul.f32 %v2579_v33, %v3054_v32  ;;  %v3188_v33 = vld [vmem:[%s441_s28] ss:$0 sm:$0xff]  ;;  %v3802_v62 = vld [vmem:[#allocation15_spill] sm:$0xff] }
  0xfb   : > { %2112 = vmatprep.mubr.msk.bf16.mxu0 %vm1064_vm2, %v1044_v46  ;;  %v1036_v36 = vadd.f32 %v1021_v3, %v1001_v53  ;;  %v1004_v61 = vadd.f32 %v3775_v44, %v969_v16  ;;  %v1237_v32 = vpop.permute.xlu1 %1236  ;;  %v3801_v41 = vld [vmem:[#allocation9_spill] sm:$0xff]  ;;  %v3803_v53 = vld [vmem:[#allocation8_spill] sm:$0xff]  ;;  %v3804_v3 = vld [vmem:[#allocation7_spill] sm:$0xff] }
  0xfc   : > { %v1045_v12 = vpack.c.bf16 %v1035_v63, %v1034_v56  ;;  %v1003_v35 = vadd.f32 %v988_v21, %v968_v4  ;;  %v3805_v56 = vld [vmem:[#allocation26_spill] sm:$0xff] }
  0xfd   : > { %v1046_v47 = vpack.c.bf16 %v1037_v30, %v1036_v36  ;;  %v1039_v48 = vadd.f32 %v3783_v49, %v1004_v61  ;;  %v1222_v31 = vpop.permute.xlu0 %1221 }
  0xfe   : > { %v1038_v2 = vadd.f32 %v1023_v10, %v1003_v35 }
  0xff   : > { %v1247_v6 = vpop.permute.xlu1 %1246 }
 0x100   : > { %v1047_v0 = vpack.c.bf16 %v1039_v48, %v1038_v2  ;;  %v3807_v48 = vld [vmem:[#allocation14_spill] sm:$0xff] }
 0x101   : > { %v1232_v44 = vpop.permute.xlu0 %1231 }
 0x102   : > { %2113 = vmatmul.mubr.msk.bf16.gmra.mrb[8].mxu0 %vm1064_vm2, %v1045_v12 }
 0x103   : > { %2116 = vmatprep.mubr.msk.bf16.mxu0 %vm1064_vm2, %v1046_v47  ;;  %v1257_v5 = vpop.permute.xlu1 %1256  ;;  %v3806_v47 = vld [vmem:[#allocation17_spill] sm:$0xff] }
 0x105   : > { %v1242_v59 = vpop.permute.xlu0 %1241 }
 0x109   : > { %v1252_v24 = vpop.permute.xlu0 %1251 }
 0x10a   : > { %2117 = vmatmul.mubr.msk.bf16.gmra.mrb[12].mxu0 %vm1064_vm2, %v1047_v0  ;;  %v3808_v0 = vld [vmem:[#allocation16_spill] sm:$0xff] }
 0x10d   : > { %v1262_v36 = vpop.permute.xlu0 %1261 }
 0x1c5   : > { %v2106_v38 = vpop.f32.mrb[0].mxu0 }
 0x1c6   : > { %v1195_v49 = vadd.f32 %v2106_v38, %v3188_v33  ;;  %v1123_v7 = vpop.f32.mrb[1].mxu0 }
 0x1c7   : > { %v1193_v20 = vadd.f32 %v3188_v33, %v1123_v7  ;;  %v2107_v39 = vpop.f32.mrb[2].mxu0 }
 0x1c8   : > { %v1291_v17 = vmul.f32 %v1222_v31, %v1195_v49  ;;  %v1196_v34 = vadd.f32 %v2107_v39, %v3188_v33  ;;  %v1126_v15 = vpop.f32.mrb[3].mxu0 }
 0x1c9   : > { %v1289_v57 = vmul.f32 %v1212_v25, %v1193_v20  ;;  %v1194_v58 = vadd.f32 %v3188_v33, %v1126_v15  ;;  %v3810_v20 = vld [vmem:[#allocation13_spill] sm:$0xff] }
 0x1ca   : > { %v1292_v42 = vmul.f32 %v1227_v37, %v1196_v34  ;;  %v1307_v55 = vmul.f32 %v1291_v17, %v2563_v23  ;;  %v3811_v17 = vld [vmem:[#allocation23_spill] sm:$0xff] }
 0x1cb   : > { %v1290_v50 = vmul.f32 %v1217_v13, %v1194_v58  ;;  %v1305_v1 = vmul.f32 %v1289_v57, %v3799_v40  ;;  %v1267_v13 = vpop.permute.xlu1 %1266 }
 0x1cc   : > { %v1308_v43 = vmul.f32 %v1292_v42, %v3801_v41  ;;  %v3209_v26 = vadd.f32 %v1307_v55, %v3803_v53  ;;  %v3812_v55 = vld [vmem:[#allocation45_spill] sm:$0xff] }
 0x1cd   : > { %v2110_v27 = vpop.f32.mrb[4].mxu0  ;;  %v3197_v52 = vadd.f32 %v1305_v1, %v3800_v9  ;;  %v1306_v29 = vmul.f32 %v1290_v50, %v2651_v14  ;;  %v3814_v41 = vld [vmem:[#allocation37_spill] sm:$0xff] }
 0x1ce   : > { %v1199_v51 = vadd.f32 %v2110_v27, %v3188_v33  ;;  %v1139_v46 = vpop.f32.mrb[5].mxu0  ;;  %v3216_v30 = vadd.f32 %v1308_v43, %v3804_v3  ;;  %v1343_v61 = vsel %vm1064_vm2, %v3209_v26, 0.0 }
 0x1cf   : > { %v1197_v60 = vadd.f32 %v3188_v33, %v1139_v46  ;;  %v2111_v22 = vpop.f32.mrb[6].mxu0  ;;  %v1337_v28 = vsel %vm1064_vm2, %v3197_v52, 0.0  ;;  %v3206_v23 = vadd.f32 %v1306_v29, %v3802_v62  ;;  %v3816_v62 = vld [vmem:[#allocation29_spill] sm:$0xff] }
 0x1d0   : > { %v1295_v8 = vmul.f32 %v1242_v59, %v1199_v51  ;;  %v1200_v14 = vadd.f32 %v2111_v22, %v3188_v33  ;;  %1338 = vadd.xlane.f32.xlu0 %v1337_v28  ;;  %v1142_v18 = vpop.f32.mrb[7].mxu0  ;;  %v3813_v51 = vld [vmem:[#allocation20_spill] sm:$0xff] }
 0x1d1   : > { %v1293_v63 = vmul.f32 %v1232_v44, %v1197_v60  ;;  %v1198_v16 = vadd.f32 %v3188_v33, %v1142_v18  ;;  %v1340_v11 = vsel %vm1064_vm2, %v3206_v23, 0.0  ;;  %v1346_v44 = vsel %vm1064_vm2, %v3216_v30, 0.0  ;;  %v1277_v60 = vpop.permute.xlu1 %1276  ;;  %v3815_v22 = vld [vmem:[#allocation32_spill] sm:$0xff] }
 0x1d2   : > { %1341 = vadd.xlane.f32.xlu1 %v1340_v11  ;;  %v1311_v4 = vmul.f32 %v1295_v8, %v3805_v56  ;;  %v1296_v21 = vmul.f32 %v1247_v6, %v1200_v14  ;;  %v1272_v6 = vpop.permute.xlu0 %1271  ;;  %v3817_v14 = vld [vmem:[#allocation43_spill] sm:$0xff] }
 0x1d3   : > { %v1294_v12 = vmul.f32 %v1237_v32, %v1198_v16  ;;  %v1309_v35 = vmul.f32 %v1293_v63, %v3806_v47  ;;  %v3809_v32 = vld [vmem:[#allocation22_spill] sm:$0xff]  ;;  %v3818_v63 = vld [vmem:[#allocation40_spill] sm:$0xff] }
 0x1d4   : > { %1344 = vadd.xlane.f32.xlu0 %v1343_v61  ;;  %v3230_v38 = vadd.f32 %v1311_v4, %v3809_v32  ;;  %v1312_v34 = vmul.f32 %v1296_v21, %v3811_v17  ;;  %v3819_v21 = vld [vmem:[#allocation27_spill] sm:$0xff] }
 0x1d5   : > { %v2114_v10 = vpop.f32.mrb[8].mxu0  ;;  %v3223_v2 = vadd.f32 %v1309_v35, %v3807_v48  ;;  %v1310_v25 = vmul.f32 %v1294_v12, %v3808_v0  ;;  %v1287_v0 = vpop.permute.xlu1 %1286 }
 0x1d6   : > { %v1203_v31 = vadd.f32 %v2114_v10, %v3188_v33  ;;  %v1155_v37 = vpop.f32.mrb[9].mxu0  ;;  %v1355_v1 = vsel %vm1064_vm2, %v3230_v38, 0.0  ;;  %v3247_v46 = vadd.f32 %v1312_v34, %v3813_v51  ;;  %v1282_v11 = vpop.permute.xlu0 %1281 }
 0x1d7   : > { %v1201_v49 = vadd.f32 %v3188_v33, %v1155_v37  ;;  %v2115_v7 = vpop.f32.mrb[10].mxu0  ;;  %v1349_v59 = vsel %vm1064_vm2, %v3223_v2, 0.0  ;;  %v3236_v39 = vadd.f32 %v1310_v25, %v3810_v20  ;;  %v3822_v20 = vld [vmem:[#allocation54_spill] sm:$0xff] }
 0x1d8   : > { %v1299_v15 = vmul.f32 %v1262_v36, %v1203_v31  ;;  %v1204_v57 = vadd.f32 %v2115_v7, %v3188_v33  ;;  %1347 = vadd.xlane.f32.xlu0 %v1346_v44  ;;  %1350 = vadd.xlane.f32.xlu1 %v1349_v59  ;;  %v1158_v58 = vpop.f32.mrb[11].mxu0  ;;  %v1358_v4 = vsel %vm1064_vm2, %v3247_v46, 0.0  ;;  %v3820_v31 = vld [vmem:[#allocation38_spill] sm:$0xff] }
 0x1d9   : > { %v1297_v42 = vmul.f32 %v1252_v24, %v1201_v49  ;;  %v1202_v50 = vadd.f32 %v3188_v33, %v1158_v58  ;;  %v1352_v29 = vsel %vm1064_vm2, %v3236_v39, 0.0  ;;  %v3821_v49 = vld [vmem:[#allocation55_spill] sm:$0xff] }
 0x1da   : > { %v1300_v40 = vmul.f32 %v1267_v13, %v1204_v57  ;;  %v1315_v27 = vmul.f32 %v1299_v15, %v3812_v55  ;;  %v3823_v57 = vld [vmem:[#allocation61_spill] sm:$0xff] }
 0x1db   : > { %v1298_v9 = vmul.f32 %v1257_v5, %v1202_v50  ;;  %v1313_v43 = vmul.f32 %v1297_v42, %v3814_v41 }
 0x1dc   : > { %1356 = vadd.xlane.f32.xlu1 %v1355_v1  ;;  %1353 = vadd.xlane.f32.xlu0 %v1352_v29  ;;  %v3256_v18 = vadd.f32 %v1315_v27, %v3817_v14  ;;  %v1316_v16 = vmul.f32 %v1300_v40, %v3818_v63  ;;  %v3825_v40 = vld [vmem:[#allocation60_spill] sm:$0xff] }
 0x1dd   : > { %v2118_v24 = vpop.f32.mrb[12].mxu0  ;;  %v3251_v28 = vadd.f32 %v1313_v43, %v3815_v22  ;;  %v1314_v53 = vmul.f32 %v1298_v9, %v3816_v62 }
 0x1de   : > { %v1207_v8 = vadd.f32 %v2118_v24, %v3188_v33  ;;  %v1171_v5 = vpop.f32.mrb[13].mxu0  ;;  %v1367_v25 = vsel %vm1064_vm2, %v3256_v18, 0.0  ;;  %v3274_v37 = vadd.f32 %v1316_v16, %v3820_v31 }
 0x1df   : > { %v1205_v3 = vadd.f32 %v3188_v33, %v1171_v5  ;;  %v2119_v56 = vpop.f32.mrb[14].mxu0  ;;  %v1361_v36 = vsel %vm1064_vm2, %v3251_v28, 0.0  ;;  %v3265_v12 = vadd.f32 %v1314_v53, %v3819_v21 }
 0x1e0   : > { %v1303_v61 = vmul.f32 %v1282_v11, %v1207_v8  ;;  %v1208_v47 = vadd.f32 %v2119_v56, %v3188_v33  ;;  %1359 = vadd.xlane.f32.xlu0 %v1358_v4  ;;  %1362 = vadd.xlane.f32.xlu1 %v1361_v36  ;;  %v1174_v35 = vpop.f32.mrb[15].mxu0  ;;  %v1370_v34 = vsel %vm1064_vm2, %v3274_v37, 0.0 }
 0x1e1   : > { %v1301_v10 = vmul.f32 %v1272_v6, %v1205_v3  ;;  %v1206_v48 = vadd.f32 %v3188_v33, %v1174_v35  ;;  %v1364_v13 = vsel %vm1064_vm2, %v3265_v12, 0.0  ;;  %v3824_v6 = vld [vmem:[#allocation49_spill] sm:$0xff] }
 0x1e2   : > { %v1304_v44 = vmul.f32 %v1287_v0, %v1208_v47  ;;  %v1319_v59 = vmul.f32 %v1303_v61, %v3782_v54 }
 0x1e3   : > { %v1302_v32 = vmul.f32 %v1277_v60, %v1206_v48  ;;  %v1317_v7 = vmul.f32 %v1301_v10, %v3821_v49 }
 0x1e4   : > { %1368 = vadd.xlane.f32.xlu1 %v1367_v25  ;;  %1365 = vadd.xlane.f32.xlu0 %v1364_v13  ;;  %v3287_v58 = vadd.f32 %v1319_v59, %v3823_v57  ;;  %v1320_v54 = vmul.f32 %v1304_v44, %v3798_v45 }
 0x1e5   : > { %v3279_v33 = vadd.f32 %v1317_v7, %v3822_v20  ;;  %v1318_v17 = vmul.f32 %v1302_v32, %v3793_v19 }
 0x1e6   : > { %v1379_v50 = vsel %vm1064_vm2, %v3287_v58, 0.0  ;;  %v3298_v1 = vadd.f32 %v1320_v54, %v3825_v40 }
 0x1e7   : > { %v1373_v15 = vsel %vm1064_vm2, %v3279_v33, 0.0  ;;  %v3290_v42 = vadd.f32 %v1318_v17, %v3824_v6 }
 0x1e8   : > { %1371 = vadd.xlane.f32.xlu0 %v1370_v34  ;;  %1374 = vadd.xlane.f32.xlu1 %v1373_v15  ;;  %v1382_v55 = vsel %vm1064_vm2, %v3298_v1, 0.0 }
 0x1e9   : > { %v1376_v19 = vsel %vm1064_vm2, %v3290_v42, 0.0 }
 0x1ec   : > { %1380 = vadd.xlane.f32.xlu1 %v1379_v50  ;;  %1377 = vadd.xlane.f32.xlu0 %v1376_v19 }
 0x1f0   : > { %1383 = vadd.xlane.f32.xlu0 %v1382_v55 }
 0x25d   : > { %v1339_v27 = vpop.xlane.xlu0 %1338 }
 0x25e   : > { %v1385_v9 = vmul.f32 0.03125, %v1339_v27 }
 0x25f   : > { %v1342_v45 = vpop.xlane.xlu1 %1341 }
 0x260   : > { %v3303_v29 = vsub.f32 %v3197_v52, %v1385_v9  ;;  %v1386_v51 = vmul.f32 0.03125, %v1342_v45 }
 0x261   : > { %v1345_v41 = vpop.xlane.xlu0 %1344 }
 0x262   : > { %v3306_v43 = vsub.f32 %v3206_v23, %v1386_v51  ;;  %v1387_v60 = vmul.f32 0.03125, %v1345_v41  ;;  %v1417_v24 = vmul.f32 %v3303_v29, %v3303_v29 }
 0x264   : > { %v3311_v22 = vsub.f32 %v3209_v26, %v1387_v60  ;;  %v1433_v62 = vsel %vm1064_vm2, %v1417_v24, 0.0  ;;  %v1418_v53 = vmul.f32 %v3306_v43, %v3306_v43 }
 0x265   : > { %v1348_v8 = vpop.xlane.xlu0 %1347  ;;  %v1351_v52 = vpop.xlane.xlu1 %1350  ;;  %1434 = vadd.xlane.f32.xlu1 %v1433_v62 }
 0x266   : > { %v1388_v5 = vmul.f32 0.03125, %v1348_v8  ;;  %v1389_v14 = vmul.f32 0.03125, %v1351_v52  ;;  %v1436_v23 = vsel %vm1064_vm2, %v1418_v53, 0.0  ;;  %v1419_v63 = vmul.f32 %v3311_v22, %v3311_v22 }
 0x267   : > { %1437 = vadd.xlane.f32.xlu0 %v1436_v23 }
 0x268   : > { %v3320_v16 = vsub.f32 %v3216_v30, %v1388_v5  ;;  %v3323_v26 = vsub.f32 %v3223_v2, %v1389_v14  ;;  %v1439_v11 = vsel %vm1064_vm2, %v1419_v63, 0.0 }
 0x269   : > { %v1357_v3 = vpop.xlane.xlu1 %1356  ;;  %v1354_v56 = vpop.xlane.xlu0 %1353  ;;  %1440 = vadd.xlane.f32.xlu1 %v1439_v11 }
 0x26a   : > { %v1391_v4 = vmul.f32 0.03125, %v1357_v3  ;;  %v1390_v36 = vmul.f32 0.03125, %v1354_v56  ;;  %v1421_v21 = vmul.f32 %v3323_v26, %v3323_v26  ;;  %v1420_v61 = vmul.f32 %v3320_v16, %v3320_v16  ;;  %v2162_v56 = vld [vmem:[%s2385_s19] sm:$0xff]  }
 0x26b   : > { %2120 = vmatprep.subr.bf16.mxu1 %v2162_v56 }
 0x26c   : > { %v3331_v47 = vsub.f32 %v3230_v38, %v1391_v4  ;;  %v3334_v30 = vsub.f32 %v3236_v39, %v1390_v36  ;;  %v1445_v2 = vsel %vm1064_vm2, %v1421_v21, 0.0  ;;  %v1442_v35 = vsel %vm1064_vm2, %v1420_v61, 0.0  ;;  %2121 = vmatpush3.bf16.msra.mxu1 %v2162_v56  ;;  %v2163_v4 = vld [vmem:[%s2385_s19 + $0x8] sm:$0xff]  }
 0x26d   : > { %v1360_v10 = vpop.xlane.xlu0 %1359  ;;  %v1363_v48 = vpop.xlane.xlu1 %1362  ;;  %1446 = vadd.xlane.f32.xlu1 %v1445_v2  ;;  %1443 = vadd.xlane.f32.xlu0 %v1442_v35 }
 0x26e   : > { %v1392_v0 = vmul.f32 0.03125, %v1360_v10  ;;  %v1393_v25 = vmul.f32 0.03125, %v1363_v48  ;;  %v1423_v13 = vmul.f32 %v3331_v47, %v3331_v47  ;;  %v1422_v38 = vmul.f32 %v3334_v30, %v3334_v30  ;;  %2122 = vmatprep.subr.bf16.mxu1 %v2163_v4 }
 0x270   : > { %v3343_v31 = vsub.f32 %v3247_v46, %v1392_v0  ;;  %v3346_v39 = vsub.f32 %v3251_v28, %v1393_v25  ;;  %v1451_v44 = vsel %vm1064_vm2, %v1423_v13, 0.0  ;;  %v1448_v32 = vsel %vm1064_vm2, %v1422_v38, 0.0  ;;  %2123 = vmatpush3.bf16.msra.mxu1 %v2163_v4  ;;  %v2228_v4 = vld [vmem:[#allocation2] sm:$0xff] }
 0x271   : > { %v1369_v49 = vpop.xlane.xlu1 %1368  ;;  %v1366_v7 = vpop.xlane.xlu0 %1365  ;;  %1452 = vadd.xlane.f32.xlu1 %v1451_v44  ;;  %1449 = vadd.xlane.f32.xlu0 %v1448_v32 }
 0x272   : > { %v1395_v59 = vmul.f32 0.03125, %v1369_v49  ;;  %v1394_v20 = vmul.f32 0.03125, %v1366_v7  ;;  %v1425_v17 = vmul.f32 %v3346_v39, %v3346_v39  ;;  %v1424_v46 = vmul.f32 %v3343_v31, %v3343_v31 }
 0x274   : > { %v3355_v34 = vsub.f32 %v3256_v18, %v1395_v59  ;;  %v3358_v28 = vsub.f32 %v3265_v12, %v1394_v20  ;;  %v1457_v15 = vsel %vm1064_vm2, %v1425_v17, 0.0  ;;  %v1454_v57 = vsel %vm1064_vm2, %v1424_v46, 0.0 }
 0x275   : > { %v1372_v6 = vpop.xlane.xlu0 %1371  ;;  %1458 = vadd.xlane.f32.xlu1 %v1457_v15  ;;  %v1375_v54 = vpop.xlane.xlu1 %1374  ;;  %1455 = vadd.xlane.f32.xlu0 %v1454_v57 }
 0x276   : > { %v1396_v50 = vmul.f32 0.03125, %v1372_v6  ;;  %v1397_v19 = vmul.f32 0.03125, %v1375_v54  ;;  %v1427_v40 = vmul.f32 %v3355_v34, %v3355_v34  ;;  %v1426_v18 = vmul.f32 %v3358_v28, %v3358_v28  ;;  %v3405_v6 = vld [vmem:[%s444_s11] ss:$0 sm:$0xff] }
 0x278   : > { %v3367_v55 = vsub.f32 %v3274_v37, %v1396_v50  ;;  %v3370_v12 = vsub.f32 %v3279_v33, %v1397_v19  ;;  %v1463_v27 = vsel %vm1064_vm2, %v1427_v40, 0.0  ;;  %v1460_v9 = vsel %vm1064_vm2, %v1426_v18, 0.0 }
 0x279   : > { %1464 = vadd.xlane.f32.xlu1 %v1463_v27  ;;  %v1381_v45 = vpop.xlane.xlu1 %1380  ;;  %1461 = vadd.xlane.f32.xlu0 %v1460_v9  ;;  %v1378_v51 = vpop.xlane.xlu0 %1377  ;;  %v3413_v9 = vld [vmem:[%s447_s18] ss:$0 sm:$0xff] }
 0x27a   : > { %v1399_v41 = vmul.f32 0.03125, %v1381_v45  ;;  %v1398_v60 = vmul.f32 0.03125, %v1378_v51  ;;  %v1429_v24 = vmul.f32 %v3370_v12, %v3370_v12  ;;  %v1428_v37 = vmul.f32 %v3367_v55, %v3367_v55 }
 0x27c   : > { %v3379_v62 = vsub.f32 %v3287_v58, %v1399_v41  ;;  %v3382_v33 = vsub.f32 %v3290_v42, %v1398_v60  ;;  %v1469_v53 = vsel %vm1064_vm2, %v1429_v24, 0.0  ;;  %v1466_v8 = vsel %vm1064_vm2, %v1428_v37, 0.0 }
 0x27d   : > { %1470 = vadd.xlane.f32.xlu1 %v1469_v53  ;;  %1467 = vadd.xlane.f32.xlu0 %v1466_v8  ;;  %v1384_v52 = vpop.xlane.xlu0 %1383 }
 0x27e   : > { %v1400_v5 = vmul.f32 0.03125, %v1384_v52  ;;  %v1431_v14 = vmul.f32 %v3379_v62, %v3379_v62  ;;  %v1430_v58 = vmul.f32 %v3382_v33, %v3382_v33 }
 0x280   : > { %v3391_v23 = vsub.f32 %v3298_v1, %v1400_v5  ;;  %v1475_v42 = vsel %vm1064_vm2, %v1431_v14, 0.0  ;;  %v1472_v63 = vsel %vm1064_vm2, %v1430_v58, 0.0 }
 0x281   : > { %1476 = vadd.xlane.f32.xlu1 %v1475_v42  ;;  %1473 = vadd.xlane.f32.xlu0 %v1472_v63 }
 0x282   : > { %v1432_v11 = vmul.f32 %v3391_v23, %v3391_v23 }
 0x284   : > { %v1478_v3 = vsel %vm1064_vm2, %v1432_v11, 0.0 }
 0x285   : > { %1479 = vadd.xlane.f32.xlu0 %v1478_v3 }
 0x2f2   : > { %v1435_v1 = vpop.xlane.xlu1 %1434 }
 0x2f3   : > { %v1481_v36 = vmul.f32 0.03125, %v1435_v1 }
 0x2f4   : > { %v1438_v21 = vpop.xlane.xlu0 %1437 }
 0x2f5   : > { %v1497_v61 = vadd.f32 1e-06, %v1481_v36  ;;  %v1482_v2 = vmul.f32 0.03125, %v1438_v21  ;;  %v2229_v36 = vld [vmem:[#allocation2 + $0x8] sm:$0xff] }
 0x2f6   : > { %v1441_v35 = vpop.xlane.xlu1 %1440 }
 0x2f7   : > { %2164 = vrsqrt.f32 %v1497_v61  ;;  %v1498_v10 = vadd.f32 1e-06, %v1482_v2  ;;  %v1483_v48 = vmul.f32 0.03125, %v1441_v35 }
 0x2f9   : > { %2166 = vrsqrt.f32 %v1498_v10  ;;  %v1499_v0 = vadd.f32 1e-06, %v1483_v48 }
 0x2fa   : > { %v1447_v25 = vpop.xlane.xlu1 %1446  ;;  %v1444_v13 = vpop.xlane.xlu0 %1443 }
 0x2fb   : > { %2168 = vrsqrt.f32 %v1499_v0  ;;  %v1485_v38 = vmul.f32 0.03125, %v1447_v25  ;;  %v1484_v44 = vmul.f32 0.03125, %v1444_v13 }
 0x2fd   : > { %v1501_v32 = vadd.f32 1e-06, %v1485_v38  ;;  %v1500_v49 = vadd.f32 1e-06, %v1484_v44 }
 0x2fe   : > { %v1453_v7 = vpop.xlane.xlu1 %1452  ;;  %v1450_v59 = vpop.xlane.xlu0 %1449 }
 0x2ff   : > { %2170 = vrsqrt.f32 %v1501_v32  ;;  %v1487_v20 = vmul.f32 0.03125, %v1453_v7  ;;  %v1486_v17 = vmul.f32 0.03125, %v1450_v59 }
 0x300   : > { %2172 = vrsqrt.f32 %v1500_v49 }
 0x301   : > { %v2165_v46 = vpop.eup %2164  ;;  %v1503_v15 = vadd.f32 1e-06, %v1487_v20  ;;  %v1502_v57 = vadd.f32 1e-06, %v1486_v17 }
 0x302   : > { %v1459_v54 = vpop.xlane.xlu1 %1458  ;;  %v1456_v50 = vpop.xlane.xlu0 %1455  ;;  %v1529_v19 = vmul.f32 %v2165_v46, %v3303_v29 }
 0x303   : > { %v2167_v40 = vpop.eup %2166  ;;  %2174 = vrsqrt.f32 %v1503_v15  ;;  %v1489_v18 = vmul.f32 0.03125, %v1459_v54  ;;  %v1488_v27 = vmul.f32 0.03125, %v1456_v50 }
 0x304   : > { %2176 = vrsqrt.f32 %v1502_v57  ;;  %v1530_v45 = vmul.f32 %v2167_v40, %v3306_v43  ;;  %v1552_v51 = vmul.f32 %v3405_v6, %v1529_v19 }
 0x305   : > { %v2169_v41 = vpop.eup %2168  ;;  %v1505_v60 = vadd.f32 1e-06, %v1489_v18  ;;  %v1504_v24 = vadd.f32 1e-06, %v1488_v27 }
 0x306   : > { %v1531_v29 = vmul.f32 %v2169_v41, %v3311_v22  ;;  %v1465_v37 = vpop.xlane.xlu1 %1464  ;;  %v1462_v53 = vpop.xlane.xlu0 %1461  ;;  %v1553_v8 = vmul.f32 %v3405_v6, %v1530_v45  ;;  %v1575_v52 = vadd.f32 %v3413_v9, %v1552_v51  ;;  %v2231_v51 = vld [vmem:[#allocation2 + $0x18] sm:$0xff] }
 0x307   : > { %2178 = vrsqrt.f32 %v1505_v60  ;;  %v1491_v5 = vmul.f32 0.03125, %v1465_v37  ;;  %v1490_v14 = vmul.f32 0.03125, %v1462_v53  ;;  %v2232_v53 = vld [vmem:[#allocation2 + $0x20] sm:$0xff] }
 0x308   : > { %2180 = vrsqrt.f32 %v1504_v24  ;;  %v1576_v58 = vadd.f32 %v3413_v9, %v1553_v8  ;;  %v1591_v1 = vadd.f32 %v2228_v4, %v1575_v52  ;;  %v1554_v61 = vmul.f32 %v3405_v6, %v1531_v29 }
 0x309   : > { %v2171_v43 = vpop.eup %2170  ;;  %v1507_v42 = vadd.f32 1e-06, %v1491_v5  ;;  %v1506_v63 = vadd.f32 1e-06, %v1490_v14 }
 0x30a   : > { %v2173_v11 = vpop.eup %2172  ;;  %v1533_v3 = vmul.f32 %v2171_v43, %v3323_v26  ;;  %v1471_v56 = vpop.xlane.xlu1 %1470  ;;  %v1592_v21 = vadd.f32 %v2229_v36, %v1576_v58 }
 0x30b   : > { %v1468_v22 = vpop.xlane.xlu0 %1467  ;;  %v1532_v2 = vmul.f32 %v2173_v11, %v3320_v16  ;;  %2182 = vrsqrt.f32 %v1507_v42  ;;  %v1493_v35 = vmul.f32 0.03125, %v1471_v56  ;;  %v1577_v16 = vadd.f32 %v3413_v9, %v1554_v61 }
 0x30c   : > { %v1492_v10 = vmul.f32 0.03125, %v1468_v22  ;;  %2184 = vrsqrt.f32 %v1506_v63  ;;  %v1607_v48 = vpack.c.bf16 %v1592_v21, %v1591_v1  ;;  %v1556_v0 = vmul.f32 %v3405_v6, %v1533_v3  ;;  %v2234_v1 = vld [vmem:[#allocation2 + $0x30] sm:$0xff]  ;;  %v2235_v21 = vld [vmem:[#allocation2 + $0x38] sm:$0xff] }
 0x30d   : > { %v2175_v25 = vpop.eup %2174  ;;  %v1509_v13 = vadd.f32 1e-06, %v1493_v35  ;;  %v1555_v38 = vmul.f32 %v3405_v6, %v1532_v2 }
 0x30e   : > { %v1508_v26 = vadd.f32 1e-06, %v1492_v10  ;;  %v2177_v44 = vpop.eup %2176  ;;  %v1535_v32 = vmul.f32 %v2175_v25, %v3331_v47  ;;  %v1477_v49 = vpop.xlane.xlu1 %1476  ;;  %2124 = vmatprep.mubr.msk.bf16.mxu1 %vm1064_vm2, %v1607_v48  ;;  %v1579_v15 = vadd.f32 %v3413_v9, %v1556_v0  ;;  %v2236_v25 = vld [vmem:[#allocation2 + $0x40] sm:$0xff] }
 0x30f   : > { %v1474_v7 = vpop.xlane.xlu0 %1473  ;;  %v1534_v59 = vmul.f32 %v2177_v44, %v3334_v30  ;;  %2186 = vrsqrt.f32 %v1509_v13  ;;  %v1495_v20 = vmul.f32 0.03125, %v1477_v49  ;;  %v1578_v46 = vadd.f32 %v3413_v9, %v1555_v38  ;;  %v2230_v30 = vld [vmem:[#allocation2 + $0x10] sm:$0xff]  ;;  %v2237_v38 = vld [vmem:[#allocation2 + $0x48] sm:$0xff] }
 0x310   : > { %v1494_v17 = vmul.f32 0.03125, %v1474_v7  ;;  %2188 = vrsqrt.f32 %v1508_v26  ;;  %v1558_v19 = vmul.f32 %v3405_v6, %v1535_v32  ;;  %v1593_v45 = vadd.f32 %v2230_v30, %v1577_v16  ;;  %v2240_v30 = vld [vmem:[#allocation2 + $0x60] sm:$0xff] }
 0x311   : > { %v2179_v57 = vpop.eup %2178  ;;  %v1511_v54 = vadd.f32 1e-06, %v1495_v20  ;;  %v1557_v47 = vmul.f32 %v3405_v6, %v1534_v59  ;;  %v1594_v41 = vadd.f32 %v2231_v51, %v1578_v46  ;;  %v1595_v8 = vadd.f32 %v2232_v53, %v1579_v15  ;;  %v2238_v15 = vld [vmem:[#allocation2 + $0x50] sm:$0xff]  ;;  %v2241_v51 = vld [vmem:[#allocation2 + $0x68] sm:$0xff] }
 0x312   : > { %v1510_v50 = vadd.f32 1e-06, %v1494_v17  ;;  %v2181_v40 = vpop.eup %2180  ;;  %v1537_v18 = vmul.f32 %v2179_v57, %v3346_v39  ;;  %v2233_v39 = vld [vmem:[#allocation2 + $0x28] sm:$0xff]  ;;  %v1581_v42 = vadd.f32 %v3413_v9, %v1558_v19 }
 0x313   : > { %v1480_v27 = vpop.xlane.xlu0 %1479  ;;  %v1536_v60 = vmul.f32 %v2181_v40, %v3343_v31  ;;  %2190 = vrsqrt.f32 %v1511_v54  ;;  %v1580_v29 = vadd.f32 %v3413_v9, %v1557_v47  ;;  %v1608_v37 = vpack.c.bf16 %v1594_v41, %v1593_v45  ;;  %v2239_v54 = vld [vmem:[#allocation2 + $0x58] sm:$0xff] }
 0x314   : > { %v1496_v24 = vmul.f32 0.03125, %v1480_v27  ;;  %2192 = vrsqrt.f32 %v1510_v50  ;;  %v1560_v52 = vmul.f32 %v3405_v6, %v1537_v18  ;;  %v1597_v36 = vadd.f32 %v2234_v1, %v1581_v42 }
 0x315   : > { %v2183_v5 = vpop.eup %2182  ;;  %v1596_v58 = vadd.f32 %v2233_v39, %v1580_v29  ;;  %v1559_v43 = vmul.f32 %v3405_v6, %v1536_v60  ;;  %2125 = vmatmul.mubr.msk.bf16.vlgmr.msra.gmra.mrb[0].mxu1 %vm1064_vm2, %v1608_v37  ;;  %v2242_v29 = vld [vmem:[#allocation2 + $0x70] sm:$0xff] }
 0x316   : > { %v1512_v14 = vadd.f32 1e-06, %v1496_v24  ;;  %v2185_v63 = vpop.eup %2184  ;;  %v1539_v31 = vmul.f32 %v2183_v5, %v3355_v34  ;;  %v1583_v22 = vadd.f32 %v3413_v9, %v1560_v52 }
 0x317   : > { %v1538_v11 = vmul.f32 %v2185_v63, %v3358_v28  ;;  %v1609_v3 = vpack.c.bf16 %v1596_v58, %v1595_v8  ;;  %v1582_v56 = vadd.f32 %v3413_v9, %v1559_v43 }
 0x318   : > { %2194 = vrsqrt.f32 %v1512_v14  ;;  %v1562_v34 = vmul.f32 %v3405_v6, %v1539_v31  ;;  %v1599_v13 = vadd.f32 %v2236_v25, %v1583_v22 }
 0x319   : > { %v2187_v4 = vpop.eup %2186  ;;  %2128 = vmatprep.mubr.msk.bf16.mxu1 %vm1064_vm2, %v1609_v3  ;;  %v1598_v61 = vadd.f32 %v2235_v21, %v1582_v56  ;;  %v1561_v2 = vmul.f32 %v3405_v6, %v1538_v11 }
 0x31a   : > { %v2189_v35 = vpop.eup %2188  ;;  %v1541_v28 = vmul.f32 %v2187_v4, %v3370_v12  ;;  %v1585_v49 = vadd.f32 %v3413_v9, %v1562_v34 }
 0x31b   : > { %v1540_v10 = vmul.f32 %v2189_v35, %v3367_v55  ;;  %v1610_v48 = vpack.c.bf16 %v1598_v61, %v1597_v36  ;;  %v1584_v0 = vadd.f32 %v3413_v9, %v1561_v2 }
 0x31c   : > { %v1564_v7 = vmul.f32 %v3405_v6, %v1541_v28  ;;  %v1601_v57 = vadd.f32 %v2238_v15, %v1585_v49 }
 0x31d   : > { %v2191_v26 = vpop.eup %2190  ;;  %v1600_v44 = vadd.f32 %v2237_v38, %v1584_v0  ;;  %v1563_v32 = vmul.f32 %v3405_v6, %v1540_v10  ;;  %2129 = vmatmul.mubr.msk.bf16.gmra.mrb[4].mxu1 %vm1064_vm2, %v1610_v48 }
 0x31e   : > { %v2193_v16 = vpop.eup %2192  ;;  %v1543_v59 = vmul.f32 %v2191_v26, %v3379_v62  ;;  %v1587_v62 = vadd.f32 %v3413_v9, %v1564_v7 }
 0x31f   : > { %v1542_v55 = vmul.f32 %v2193_v16, %v3382_v33  ;;  %v1611_v12 = vpack.c.bf16 %v1600_v44, %v1599_v13  ;;  %v1586_v20 = vadd.f32 %v3413_v9, %v1563_v32 }
 0x320   : > { %v1566_v17 = vmul.f32 %v3405_v6, %v1543_v59  ;;  %v1603_v45 = vadd.f32 %v2240_v30, %v1587_v62 }
 0x321   : > { %2132 = vmatprep.mubr.msk.bf16.mxu1 %vm1064_vm2, %v1611_v12  ;;  %v1602_v50 = vadd.f32 %v2239_v54, %v1586_v20  ;;  %v1565_v47 = vmul.f32 %v3405_v6, %v1542_v55 }
 0x322   : > { %v2195_v46 = vpop.eup %2194  ;;  %v1589_v27 = vadd.f32 %v3413_v9, %v1566_v17 }
 0x323   : > { %v1544_v19 = vmul.f32 %v2195_v46, %v3391_v23  ;;  %v1612_v40 = vpack.c.bf16 %v1602_v50, %v1601_v57  ;;  %v1588_v33 = vadd.f32 %v3413_v9, %v1565_v47  ;;  %v2243_v23 = vld [vmem:[#allocation2 + $0x78] sm:$0xff] }
 0x324   : > { %v1605_v37 = vadd.f32 %v2242_v29, %v1589_v27 }
 0x325   : > { %v1567_v18 = vmul.f32 %v3405_v6, %v1544_v19  ;;  %v1604_v41 = vadd.f32 %v2241_v51, %v1588_v33  ;;  %2133 = vmatmul.mubr.msk.bf16.gmra.mrb[8].mxu1 %vm1064_vm2, %v1612_v40  ;;  %v3475_v6 = vld [vmem:[%s455_s2] ss:$0 sm:$0xff]  ;;  %s2283_s2 = smov [#allocation2]  }
 0x326   : > { %s1925_s15 = sshll.u32 %s2283_s2, 4  ;;  %s1926_s15 = int_to_ptr.vmem [resolvable:$true] %s1925_s15 }
 0x327   : > { %v1590_v60 = vadd.f32 %v3413_v9, %v1567_v18  ;;  %v1613_v24 = vpack.c.bf16 %v1604_v41, %v1603_v45  ;;  %s2244_s30 = scalar_lea.vmem %s1926_s15, 2048  ;;  %p2251_p9 = scmp.lt.s32.totalorder %s1926_s15, %s1926_s15 }
 0x328   : > { %p2245_p6 = scmp.ne.s32.totalorder %s1926_s15, %s2244_s30  ;;  %p2252_p10 = scmp.lt.s32.totalorder %s2244_s30, %s2244_s30 }
 0x329   : > { %v1606_v53 = vadd.f32 %v2243_v23, %v1590_v60  ;;  %2136 = vmatprep.mubr.msk.bf16.mxu1 %vm1064_vm2, %v1613_v24 }
 0x32a   : > { %p2246_p7 = pnand %p2245_p6, %p2144_p5  ;;  %p2253_p11 = por %p2252_p10, %p2251_p9 }
 0x32b   : > { %v1614_v8 = vpack.c.bf16 %v1606_v53, %v1605_v37 }
 0x32c   : > { %p2247_p8 = pneg %p2246_p7 }
 0x32d   : > { %2137 = vmatmul.mubr.msk.bf16.gmra.mrb[12].mxu1 %vm1064_vm2, %v1614_v8 }
 0x32e   : > { %p2254_p12 = pnand %p2253_p11, %p2247_p8 }
 0x3e8   : > { %v2126_v52 = vpop.f32.mrb[0].mxu1 }
 0x3e9   : > { %v1705_v5 = vadd.f32 %v2126_v52, %v3475_v6  ;;  %v1696_v9 = vpop.f32.mrb[1].mxu1 }
 0x3ea   : > { %v1697_v14 = vadd.f32 %v3475_v6, %v1696_v9  ;;  %v2127_v39 = vpop.f32.mrb[2].mxu1 }
 0x3eb   : > { %v1777_v58 = vmul.f32 %v1705_v5, %v1705_v5  ;;  %v3480_v43 = vadd.f32 %v2127_v39, %v3475_v6  ;;  %v1699_v42 = vpop.f32.mrb[3].mxu1  ;;  %v1761_v45 = vmul.f32 0.5, %v1705_v5 }
 0x3ec   : > { %v1775_v63 = vmul.f32 %v1697_v14, %v1697_v14  ;;  %v3483_v31 = vadd.f32 %v3475_v6, %v1699_v42  ;;  %v1759_v29 = vmul.f32 0.5, %v1697_v14 }
 0x3ed   : > { %v1793_v11 = vmul.f32 %v1777_v58, %v1705_v5  ;;  %v1778_v3 = vmul.f32 %v3480_v43, %v3480_v43 }
 0x3ee   : > { %v1791_v56 = vmul.f32 %v1775_v63, %v1697_v14  ;;  %v1776_v22 = vmul.f32 %v3483_v31, %v3483_v31  ;;  %v1760_v42 = vmul.f32 0.5, %v3483_v31 }
 0x3ef   : > { %v1809_v4 = vmul.f32 0.044715, %v1793_v11  ;;  %v1794_v1 = vmul.f32 %v1778_v3, %v3480_v43 }
 0x3f0   : > { %v1807_v36 = vmul.f32 0.044715, %v1791_v56  ;;  %v1792_v21 = vmul.f32 %v1776_v22, %v3483_v31  ;;  %v2130_v61 = vpop.f32.mrb[4].mxu1 }
 0x3f1   : > { %v1825_v2 = vadd.f32 %v1809_v4, %v1705_v5  ;;  %v1810_v34 = vmul.f32 0.044715, %v1794_v1  ;;  %v3492_v35 = vadd.f32 %v2130_v61, %v3475_v6  ;;  %v1712_v28 = vpop.f32.mrb[5].mxu1  ;;  %v1762_v5 = vmul.f32 0.5, %v3480_v43 }
 0x3f2   : > { %v1823_v10 = vadd.f32 %v1807_v36, %v1697_v14  ;;  %v1808_v48 = vmul.f32 0.044715, %v1792_v21  ;;  %v3495_v0 = vadd.f32 %v3475_v6, %v1712_v28  ;;  %v2131_v25 = vpop.f32.mrb[6].mxu1 }
 0x3f3   : > { %v1841_v13 = vmul.f32 0.7978846, %v1825_v2  ;;  %v1826_v26 = vadd.f32 %v1810_v34, %v3480_v43  ;;  %v1781_v38 = vmul.f32 %v3492_v35, %v3492_v35  ;;  %v1715_v44 = vpop.f32.mrb[7].mxu1  ;;  %v3505_v55 = vadd.f32 %v2131_v25, %v3475_v6 }
 0x3f4   : > { %v1839_v32 = vmul.f32 0.7978846, %v1823_v10  ;;  %v1824_v49 = vadd.f32 %v1808_v48, %v3483_v31  ;;  %v1779_v7 = vmul.f32 %v3495_v0, %v3495_v0  ;;  %v3509_v17 = vadd.f32 %v3475_v6, %v1715_v44 }
 0x3f5   : > { %2196 = vtanh.f32 %v1841_v13  ;;  %v1842_v16 = vmul.f32 0.7978846, %v1826_v26  ;;  %v1797_v59 = vmul.f32 %v1781_v38, %v3492_v35  ;;  %v1782_v15 = vmul.f32 %v3505_v55, %v3505_v55 }
 0x3f6   : > { %2198 = vtanh.f32 %v1839_v32  ;;  %v1840_v12 = vmul.f32 0.7978846, %v1824_v49  ;;  %v1795_v20 = vmul.f32 %v1779_v7, %v3495_v0  ;;  %v1780_v54 = vmul.f32 %v3509_v17, %v3509_v17 }
 0x3f7   : > { %2200 = vtanh.f32 %v1842_v16  ;;  %v1813_v46 = vmul.f32 0.044715, %v1797_v59  ;;  %v1798_v62 = vmul.f32 %v1782_v15, %v3505_v55 }
 0x3f8   : > { %2202 = vtanh.f32 %v1840_v12  ;;  %v1811_v57 = vmul.f32 0.044715, %v1795_v20  ;;  %v2134_v50 = vpop.f32.mrb[8].mxu1  ;;  %v1796_v18 = vmul.f32 %v1780_v54, %v3509_v17 }
 0x3f9   : > { %v1829_v47 = vadd.f32 %v1813_v46, %v3492_v35  ;;  %v3518_v19 = vadd.f32 %v2134_v50, %v3475_v6  ;;  %v1728_v40 = vpop.f32.mrb[9].mxu1  ;;  %v1814_v41 = vmul.f32 0.044715, %v1798_v62 }
 0x3fa   : > { %v1827_v33 = vadd.f32 %v1811_v57, %v3495_v0  ;;  %v3523_v27 = vadd.f32 %v3475_v6, %v1728_v40  ;;  %v2135_v30 = vpop.f32.mrb[10].mxu1  ;;  %v1812_v23 = vmul.f32 0.044715, %v1796_v18 }
 0x3fb   : > { %v1845_v51 = vmul.f32 0.7978846, %v1829_v47  ;;  %v1785_v60 = vmul.f32 %v3518_v19, %v3518_v19  ;;  %v1731_v24 = vpop.f32.mrb[11].mxu1  ;;  %v1830_v8 = vadd.f32 %v1814_v41, %v3505_v55  ;;  %v3532_v9 = vadd.f32 %v2135_v30, %v3475_v6 }
 0x3fc   : > { %v1843_v37 = vmul.f32 0.7978846, %v1827_v33  ;;  %v1783_v53 = vmul.f32 %v3523_v27, %v3523_v27  ;;  %v1828_v39 = vadd.f32 %v1812_v23, %v3509_v17  ;;  %v3541_v36 = vadd.f32 %v3475_v6, %v1731_v24 }
 0x3fd   : > { %2204 = vtanh.f32 %v1845_v51  ;;  %v1801_v52 = vmul.f32 %v1785_v60, %v3518_v19  ;;  %v1846_v63 = vmul.f32 0.7978846, %v1830_v8  ;;  %v1786_v3 = vmul.f32 %v3532_v9, %v3532_v9 }
 0x3fe   : > { %2206 = vtanh.f32 %v1843_v37  ;;  %v1799_v14 = vmul.f32 %v1783_v53, %v3523_v27  ;;  %v1844_v4 = vmul.f32 0.7978846, %v1828_v39  ;;  %v1784_v16 = vmul.f32 %v3541_v36, %v3541_v36 }
 0x3ff   : > { %v2197_v58 = vpop.eup %2196  ;;  %v1817_v11 = vmul.f32 0.044715, %v1801_v52  ;;  %2208 = vtanh.f32 %v1846_v63  ;;  %v1802_v2 = vmul.f32 %v1786_v3, %v3532_v9  ;;  %v1765_v47 = vmul.f32 0.5, %v3492_v35 }
 0x400   : > { %v2199_v56 = vpop.eup %2198  ;;  %v1873_v22 = vadd.f32 1.0, %v2197_v58  ;;  %v1815_v1 = vmul.f32 0.044715, %v1799_v14  ;;  %v2138_v31 = vpop.f32.mrb[12].mxu1  ;;  %2210 = vtanh.f32 %v1844_v4  ;;  %v1800_v57 = vmul.f32 %v1784_v16, %v3541_v36 }
 0x401   : > { %v2201_v43 = vpop.eup %2200  ;;  %v1871_v21 = vadd.f32 1.0, %v2199_v56  ;;  %v1833_v61 = vadd.f32 %v1817_v11, %v3518_v19  ;;  %v1744_v25 = vpop.f32.mrb[13].mxu1  ;;  %v1818_v44 = vmul.f32 0.044715, %v1802_v2  ;;  %v3550_v59 = vadd.f32 %v2138_v31, %v3475_v6 }
 0x402   : > { %v2203_v34 = vpop.eup %2202  ;;  %v1889_v28 = vmul.f32 %v1873_v22, %v1761_v45  ;;  %v1874_v10 = vadd.f32 1.0, %v2201_v43  ;;  %v1831_v48 = vadd.f32 %v1815_v1, %v3523_v27  ;;  %v2139_v32 = vpop.f32.mrb[14].mxu1  ;;  %v3555_v15 = vadd.f32 %v3475_v6, %v1744_v25 }
 0x403   : > { %v1887_v13 = vmul.f32 %v1871_v21, %v1759_v29  ;;  %v1872_v26 = vadd.f32 1.0, %v2203_v34  ;;  %v1849_v38 = vmul.f32 0.7978846, %v1833_v61  ;;  %v1747_v12 = vpop.f32.mrb[15].mxu1  ;;  %v1834_v46 = vadd.f32 %v1818_v44, %v3532_v9 }
 0x404   : > { %1905 = vst.msk [vmem:[#allocation2 + $0x10] sm:$0xff] %vm1064_vm2, %v1889_v28  ;;  %v1890_v49 = vmul.f32 %v1874_v10, %v1762_v5  ;;  %v1847_v7 = vmul.f32 0.7978846, %v1831_v48  ;;  %v1789_v54 = vmul.f32 %v3550_v59, %v3550_v59  ;;  %v1787_v40 = vmul.f32 %v3555_v15, %v3555_v15 }
 0x405   : > { %1903 = vst.msk [vmem:[#allocation2] sm:$0xff] %vm1064_vm2, %v1887_v13  ;;  %v1888_v20 = vmul.f32 %v1872_v26, %v1760_v42  ;;  %2212 = vtanh.f32 %v1849_v38  ;;  %v1850_v62 = vmul.f32 0.7978846, %v1834_v46  ;;  %v3566_v33 = vadd.f32 %v2139_v32, %v3475_v6 }
 0x406   : > { %1906 = vst.msk [vmem:[#allocation2 + $0x18] sm:$0xff] %vm1064_vm2, %v1890_v49  ;;  %2214 = vtanh.f32 %v1847_v7  ;;  %v1816_v45 = vmul.f32 0.044715, %v1800_v57  ;;  %v1805_v51 = vmul.f32 %v1789_v54, %v3550_v59  ;;  %v3570_v41 = vadd.f32 %v3475_v6, %v1747_v12 }
 0x407   : > { %v2205_v50 = vpop.eup %2204  ;;  %1904 = vst.msk [vmem:[#allocation2 + $0x8] sm:$0xff] %vm1064_vm2, %v1888_v20  ;;  %v1763_v60 = vmul.f32 0.5, %v3495_v0  ;;  %2216 = vtanh.f32 %v1850_v62  ;;  %v1803_v35 = vmul.f32 %v1787_v40, %v3555_v15  ;;  %v1790_v53 = vmul.f32 %v3566_v33, %v3566_v33 }
 0x408   : > { %v2207_v18 = vpop.eup %2206  ;;  %v1877_v30 = vadd.f32 1.0, %v2205_v50  ;;  %v1832_v37 = vadd.f32 %v1816_v45, %v3541_v36  ;;  %v1821_v23 = vmul.f32 0.044715, %v1805_v51  ;;  %v1766_v5 = vmul.f32 0.5, %v3505_v55 }
 0x409   : > { %v1875_v24 = vadd.f32 1.0, %v2207_v18  ;;  %v2209_v8 = vpop.eup %2208  ;;  %v1819_v39 = vmul.f32 0.044715, %v1803_v35  ;;  %v1788_v6 = vmul.f32 %v3570_v41, %v3570_v41  ;;  %v1806_v63 = vmul.f32 %v1790_v53, %v3566_v33 }
 0x40a   : > { %v1893_v29 = vmul.f32 %v1877_v30, %v1765_v47  ;;  %v2211_v0 = vpop.eup %2210  ;;  %v1878_v14 = vadd.f32 1.0, %v2209_v8  ;;  %v1848_v58 = vmul.f32 0.7978846, %v1832_v37  ;;  %v1837_v42 = vadd.f32 %v1821_v23, %v3550_v59 }
 0x40b   : > { %v1891_v52 = vmul.f32 %v1875_v24, %v1763_v60  ;;  %v1764_v11 = vmul.f32 0.5, %v3509_v17  ;;  %v1876_v3 = vadd.f32 1.0, %v2211_v0  ;;  %v1835_v55 = vadd.f32 %v1819_v39, %v3555_v15 }
 0x40c   : > { %1909 = vst.msk [vmem:[#allocation2 + $0x30] sm:$0xff] %vm1064_vm2, %v1893_v29  ;;  %v1804_v56 = vmul.f32 %v1788_v6, %v3570_v41  ;;  %v1894_v22 = vmul.f32 %v1878_v14, %v1766_v5  ;;  %2218 = vtanh.f32 %v1848_v58  ;;  %v1853_v4 = vmul.f32 0.7978846, %v1837_v42 }
 0x40d   : > { %1907 = vst.msk [vmem:[#allocation2 + $0x20] sm:$0xff] %vm1064_vm2, %v1891_v52  ;;  %v1822_v1 = vmul.f32 0.044715, %v1806_v63  ;;  %v1892_v21 = vmul.f32 %v1876_v3, %v1764_v11  ;;  %v1851_v61 = vmul.f32 0.7978846, %v1835_v55  ;;  %v1769_v34 = vmul.f32 0.5, %v3518_v19 }
 0x40e   : > { %v1820_v2 = vmul.f32 0.044715, %v1804_v56  ;;  %1910 = vst.msk [vmem:[#allocation2 + $0x38] sm:$0xff] %vm1064_vm2, %v1894_v22  ;;  %2220 = vtanh.f32 %v1853_v4  ;;  %v1767_v10 = vmul.f32 0.5, %v3523_v27  ;;  %v1770_v19 = vmul.f32 0.5, %v3532_v9 }
 0x40f   : > { %v2213_v43 = vpop.eup %2212  ;;  %v1838_v17 = vadd.f32 %v1822_v1, %v3566_v33  ;;  %1908 = vst.msk [vmem:[#allocation2 + $0x28] sm:$0xff] %vm1064_vm2, %v1892_v21  ;;  %2222 = vtanh.f32 %v1851_v61  ;;  %v1768_v16 = vmul.f32 0.5, %v3541_v36  ;;  %v1773_v54 = vmul.f32 0.5, %v3550_v59 }
 0x410   : > { %v2215_v31 = vpop.eup %2214  ;;  %v1881_v28 = vadd.f32 1.0, %v2213_v43  ;;  %v1836_v25 = vadd.f32 %v1820_v2, %v3570_v41  ;;  %v1771_v9 = vmul.f32 0.5, %v3555_v15  ;;  %v1774_v36 = vmul.f32 0.5, %v3566_v33 }
 0x411   : > { %v1879_v48 = vadd.f32 1.0, %v2215_v31  ;;  %v1854_v26 = vmul.f32 0.7978846, %v1838_v17  ;;  %v2217_v38 = vpop.eup %2216  ;;  %v1772_v59 = vmul.f32 0.5, %v3570_v41 }
 0x412   : > { %v1897_v13 = vmul.f32 %v1881_v28, %v1769_v34  ;;  %v1852_v32 = vmul.f32 0.7978846, %v1836_v25  ;;  %v1882_v49 = vadd.f32 1.0, %v2217_v38 }
 0x413   : > { %v1895_v44 = vmul.f32 %v1879_v48, %v1767_v10  ;;  %2224 = vtanh.f32 %v1854_v26 }
 0x414   : > { %1913 = vst.msk [vmem:[#allocation2 + $0x50] sm:$0xff] %vm1064_vm2, %v1897_v13  ;;  %2226 = vtanh.f32 %v1852_v32  ;;  %v1898_v7 = vmul.f32 %v1882_v49, %v1770_v19 }
 0x415   : > { %1911 = vst.msk [vmem:[#allocation2 + $0x40] sm:$0xff] %vm1064_vm2, %v1895_v44 }
 0x416   : > { %v2219_v27 = vpop.eup %2218  ;;  %1914 = vst.msk [vmem:[#allocation2 + $0x58] sm:$0xff] %vm1064_vm2, %v1898_v7 }
 0x417   : > { %v1880_v12 = vadd.f32 1.0, %v2219_v27 }
 0x418   : > { %v2221_v20 = vpop.eup %2220 }
 0x419   : > { %v2223_v46 = vpop.eup %2222  ;;  %v1896_v57 = vmul.f32 %v1880_v12, %v1768_v16  ;;  %v1885_v50 = vadd.f32 1.0, %v2221_v20 }
 0x41a   : > { %v1883_v47 = vadd.f32 1.0, %v2223_v46 }
 0x41b   : > { %1912 = vst.msk [vmem:[#allocation2 + $0x48] sm:$0xff] %vm1064_vm2, %v1896_v57  ;;  %v1901_v62 = vmul.f32 %v1885_v50, %v1773_v54 }
 0x41c   : > { %v1899_v18 = vmul.f32 %v1883_v47, %v1771_v9 }
 0x41d   : > { %v2225_v40 = vpop.eup %2224  ;;  %1917 = vst.msk [vmem:[#allocation2 + $0x70] sm:$0xff] %vm1064_vm2, %v1901_v62 }
 0x41e   : > { %v2227_v30 = vpop.eup %2226  ;;  %v1886_v45 = vadd.f32 1.0, %v2225_v40  ;;  %1915 = vst.msk [vmem:[#allocation2 + $0x60] sm:$0xff] %vm1064_vm2, %v1899_v18 }
 0x41f   : > { %v1884_v15 = vadd.f32 1.0, %v2227_v30 }
 0x420   : > { %v1902_v51 = vmul.f32 %v1886_v45, %v1774_v36 }
 0x421   : > { %v1900_v60 = vmul.f32 %v1884_v15, %v1772_v59 }
 0x422   : > { %1918 = vst.msk [vmem:[#allocation2 + $0x78] sm:$0xff] %vm1064_vm2, %v1902_v51 }
 0x423   : > { %1916 = vst.msk [vmem:[#allocation2 + $0x68] sm:$0xff] %vm1064_vm2, %v1900_v60 }
 0x424   : > { %2257 = shalt.err (!%p2254_p12)
}
 0x425   : > { %s2258_s16 = scalar_lea.hbm %s3643_s10, 2048 }
 0x426   : > { %p2259_p13 = scmp.ne.s32.totalorder %s3643_s10, %s2258_s16  ;;  %p2264_p2 = scmp.lt.u32.totalorder %s2258_s16, %s3643_s10 }
 0x428   : > { %p2260_p0 = pnand %p2259_p13, %p2144_p5 }
 0x42a   : > { %p2261_p1 = pneg %p2260_p0 }
 0x42c   : > { %p2266_p3 = pnand %p2264_p2, %p2261_p1 }
 0x42e   : > { %2269 = shalt.err (!%p2266_p3)
}
 0x42f   : > { %s2284_s24 = smov 128   ;;  %s2285_s22 = smov 8  }
 0x430   : > { %2141 = dma.vmem_to_hbm [thread:$0]  (%p2144_p5), %s1926_s15, 2048, %s3643_s10, [#allocation3], %s2284_s24, %s2284_s24, %s2285_s22  }
 0x431   : > { %2275 = dma.done.wait (%p2144_p5), [#allocation3], 2048  }
 0x432   : > { %2277 = vsyncadd (%p2144_p5), [#allocation3], 4294965248 }
 0x433 PF: > { %s21_s13 = sadd.s32 1, %s2280_s13  }
 0x434   : > { %p18_p4 = scmp.ge.s32.totalorder %s21_s13, 4  }
 0x436   :  { %20 = sbr.rel (!%p18_p4) target bundleno = 3 (0x3), region = 112 }
 0x43d   :  { %1941 = vsyncpa [#allocation3], 1 }
 0x43e   :  { %1943 = vsyncpa [#allocation3 + $0x1], 1 }

</bundles_post_ra>
